<compile_context>
chip_gen: v7x
topology: tpu7x:2x2x1
jax: 0.10.0
libtpu: 0.0.40
codegen_flags: <defaults>
</compile_context>

<pallas_src>
import jax
import jax.numpy as jnp
from jax.experimental import pallas as pl
from jax.experimental.pallas import tpu as pltpu


# ---------------- model hyper-parameters (match the module __init__) ----------
N = 16                       # nodes per graph
IN_FEATS = 8
N_HIDDEN = [16, 16]          # two WaveGIN layers
ACTIVE_NODES = 4             # K (soft-attention readout nodes)
CHANNEL = 4                  # conv_1 output channels
CONV_SIZE = sum(N_HIDDEN)    # 32
FC1_IN = CHANNEL * ACTIVE_NODES
FC1_OUT = 128
FC2_OUT = 2

# ---------------- batching / tiling -------------------------------------------
B_TOTAL = 16                 # graphs in the batch
GPG = 8                      # graphs per grid step  (GPG*N = 128 node rows/step)
NUM_GROUPS = B_TOTAL // GPG
F_PAD = 128                  # every activation padded to one full lane tile
KP = 8                       # ACTIVE_NODES padded to one sublane tile


# ---------------- packed weight slab layout (rows x 128 lanes, bf16) ----------
def _layout():
    off, rows = 0, {}
    for name, n in (("WG0", F_PAD), ("BG0", 8), ("WG1", F_PAD), ("BG1", 8),
                    ("P0T", KP), ("P1T", KP), ("WCA", F_PAD), ("WCB", F_PAD),
                    ("BC", 8), ("WF1", ACTIVE_NODES * F_PAD), ("BF1", 8),
                    ("WF2", F_PAD), ("BF2", 8)):
        rows[name] = off
        off += n
    off = ((off + 15) // 16) * 16        # keep bf16 sublane packing happy
    return rows, off


_R, SLAB_ROWS = _layout()


# ---------------- kernel -------------------------------------------------------
def wavegin_kernel(a_ref, h_ref, e_ref, w_ref, out_ref):
    f32, bf16 = jnp.float32, jnp.bfloat16
    A = a_ref[...]                               # (GPG, N, N)      bf16
    H = h_ref[...]                               # (GPG, N, F_PAD)  bf16
    eps_rows = e_ref[...]                        # (2, F_PAD) f32, rows = 1+eps_l

    def w(name, rows):
        base = _R[name]
        return w_ref[base:base + rows, :]        # full-lane, row-aligned reads

    wg0, bg0 = w("WG0", F_PAD), w("BG0", 1)
    wg1, bg1 = w("WG1", F_PAD), w("BG1", 1)
    p0t, p1t = w("P0T", KP), w("P1T", KP)
    wca, wcb, bc = w("WCA", F_PAD), w("WCB", F_PAD), w("BC", 1)
    wf1, bf1 = w("WF1", ACTIVE_NODES * F_PAD), w("BF1", 1)
    wf2, bf2 = w("WF2", F_PAD), w("BF2", 1)

    # ---- WaveGIN layer: relu(((1+eps)h + A@h) @ W + b), batched over graphs --
    def gin_layer(h_bf, self_row, wg, bg):
        ah = jnp.einsum("gij,gjf->gif", A, h_bf, preferred_element_type=f32)
        pre = (ah + self_row * h_bf.astype(f32)).astype(bf16)
        z = jnp.dot(pre.reshape(GPG * N, F_PAD), wg, preferred_element_type=f32)
        hn = jnp.maximum(z + bg.astype(f32), 0.0)
        return hn.astype(bf16).reshape(GPG, N, F_PAD)

    h0 = gin_layer(H, eps_rows[0:1, :], wg0, bg0)        # (GPG, N, 128)
    h1 = gin_layer(h0, eps_rows[1:2, :], wg1, bg1)       # (GPG, N, 128)

    # ---- soft-attention pooling: batched over graphs, node axis kept in lanes
    def pool(h_bf, projT):
        pw = jnp.broadcast_to(projT, (GPG, KP, F_PAD)).astype(bf16)
        sT = jnp.einsum("gkf,gnf->gkn", pw, h_bf, preferred_element_type=f32)
        sT = sT - jnp.max(sT, axis=-1, keepdims=True)
        e = jnp.exp(sT)
        att = e * pl.reciprocal(jnp.sum(e, axis=-1, keepdims=True), approx=True)
        r = jnp.einsum("gkn,gnf->gkf", att.astype(bf16), h_bf,
                       preferred_element_type=f32)        # (GPG, KP, 128)
        return r.reshape(GPG * KP, F_PAD).astype(bf16)

    r0 = pool(h0, p0t)                                    # (GPG*KP, 128)
    r1 = pool(h1, p1t)                                    # (GPG*KP, 128)

    # ---- Conv1d(1, C, kernel=32, stride=32) == two matmuls (no feature concat)
    conv = jnp.maximum(
        jnp.dot(r0, wca, preferred_element_type=f32)
        + jnp.dot(r1, wcb, preferred_element_type=f32)
        + bc.astype(f32), 0.0)                            # (GPG*KP, 128)
    conv = conv.astype(bf16).reshape(GPG, KP, F_PAD)

    # ---- NCHW flatten folded into the fc1 weight: lane-concat the K node rows
    conv_cat = jnp.concatenate(
        [conv[:, k, :] for k in range(ACTIVE_NODES)], axis=1)   # (GPG, K*128)
    fc1 = jnp.maximum(
        jnp.dot(conv_cat, wf1, preferred_element_type=f32) + bf1.astype(f32), 0.0)
    # TODO(synk): dropout before fc_1 / fc_2 is identity (eval semantics).
    fc2 = jnp.dot(fc1.astype(bf16), wf2, preferred_element_type=f32) + bf2.astype(f32)
    out_ref[...] = 1.0 / (1.0 + jnp.exp(-fc2))            # sigmoid, lane-dense store


# ---------------- one-time weight packing (hoisted out of the hot path) -------
def pack_params(params):
    (_eps, wg0, bg0, wg1, bg1, p0, p1, wc, bc, wf1, bf1, wf2, bf2) = params
    s = jnp.zeros((SLAB_ROWS, F_PAD), jnp.float32)
    s = s.at[_R["WG0"]:_R["WG0"] + IN_FEATS, :N_HIDDEN[0]].set(wg0)
    s = s.at[_R["BG0"], :N_HIDDEN[0]].set(bg0[0])
    s = s.at[_R["WG1"]:_R["WG1"] + N_HIDDEN[0], :N_HIDDEN[1]].set(wg1)
    s = s.at[_R["BG1"], :N_HIDDEN[1]].set(bg1[0])
    s = s.at[_R["P0T"]:_R["P0T"] + ACTIVE_NODES, :N_HIDDEN[0]].set(p0.T)
    s = s.at[_R["P1T"]:_R["P1T"] + ACTIVE_NODES, :N_HIDDEN[1]].set(p1.T)
    s = s.at[_R["WCA"]:_R["WCA"] + N_HIDDEN[0], :CHANNEL].set(wc[:, :N_HIDDEN[0]].T)
    s = s.at[_R["WCB"]:_R["WCB"] + N_HIDDEN[1], :CHANNEL].set(wc[:, N_HIDDEN[0]:].T)
    s = s.at[_R["BC"], :CHANNEL].set(bc[0])
    # NCHW flatten (index m = c*K + k) folded into k-blocked fc1 weight slabs.
    wf1_t = wf1.T                                            # (FC1_IN, 128)
    for k in range(ACTIVE_NODES):
        rows = _R["WF1"] + k * F_PAD
        s = s.at[rows:rows + CHANNEL, :].set(wf1_t[k::ACTIVE_NODES, :])
    s = s.at[_R["BF1"], :].set(bf1[0])
    s = s.at[_R["WF2"]:_R["WF2"] + FC1_OUT, :FC2_OUT].set(wf2.T)
    s = s.at[_R["BF2"], :FC2_OUT].set(bf2[0])
    return s.astype(jnp.bfloat16)


# ---------------- forward wrapper ---------------------------------------------
@jax.jit
def wavegin_forward(A, H, eps, slab):
    """A: (B,N,N) f32, H: (B,N,IN_FEATS) f32, eps: (1,2) f32, slab: packed bf16."""
    a_bf = A.astype(jnp.bfloat16)
    h_pad = jnp.pad(H.astype(jnp.bfloat16),
                    ((0, 0), (0, 0), (0, F_PAD - IN_FEATS)))
    eps_rows = jnp.broadcast_to((1.0 + eps[0])[:, None], (2, F_PAD)).astype(jnp.float32)

    out = pl.pallas_call(
        wavegin_kernel,
        out_shape=jax.ShapeDtypeStruct((B_TOTAL, F_PAD), jnp.float32),
        grid=(NUM_GROUPS,),
        in_specs=[
            pl.BlockSpec((GPG, N, N), lambda g: (g, 0, 0)),          # adjacency
            pl.BlockSpec((GPG, N, F_PAD), lambda g: (g, 0, 0)),      # node feats
            pl.BlockSpec((2, F_PAD), lambda g: (0, 0)),              # 1+eps rows
            pl.BlockSpec((SLAB_ROWS, F_PAD), lambda g: (0, 0)),      # weight slab
        ],
        out_specs=pl.BlockSpec((GPG, F_PAD), lambda g: (g, 0)),
        compiler_params=pltpu.CompilerParams(
            dimension_semantics=("parallel",)),
    )(a_bf, h_pad, eps_rows, slab)
    return out[:, :FC2_OUT]


# ---------------- pure-JAX reference (original parameter layouts / math) ------
def reference_forward(A, H, params):
    (eps, wg0, bg0, wg1, bg1, p0, p1, wc, bc, wf1, bf1, wf2, bf2) = params

    def one(a, h):
        h0 = jnp.maximum(((1.0 + eps[0, 0]) * h + a @ h) @ wg0 + bg0[0], 0.0)
        h1 = jnp.maximum(((1.0 + eps[0, 1]) * h0 + a @ h0) @ wg1 + bg1[0], 0.0)

        def pool(feat, p):
            att = jax.nn.softmax(feat @ p, axis=0)
            return att.T @ feat

        merged = jnp.concatenate([pool(h0, p0), pool(h1, p1)], axis=1)   # (K, 32)
        conv = jnp.maximum(merged @ wc.T + bc[0], 0.0)                    # (K, C)
        flat = conv.T.reshape(-1)                       # channel-major (NCHW) flatten
        fc1 = jnp.maximum(flat @ wf1.T + bf1[0], 0.0)
        fc2 = fc1 @ wf2.T + bf2[0]
        return jax.nn.sigmoid(fc2)

    return jax.vmap(one)(A, H)


if __name__ == "__main__":
    key = jax.random.PRNGKey(0)
    keys = jax.random.split(key, 16)

    # graph inputs: symmetric binary adjacency + node features
    adj = (jax.random.uniform(keys[0], (B_TOTAL, N, N)) < 0.3).astype(jnp.float32)
    adj = jnp.maximum(adj, jnp.transpose(adj, (0, 2, 1)))
    H = jax.random.normal(keys[1], (B_TOTAL, N, IN_FEATS), dtype=jnp.float32)

    def init(k, shape, scale=0.1):
        return scale * jax.random.normal(k, shape, dtype=jnp.float32)

    params = (
        jnp.array([[0.05, -0.03]], jnp.float32),           # learnable eps per layer
        init(keys[2], (IN_FEATS, N_HIDDEN[0])),            # wg0
        init(keys[3], (1, N_HIDDEN[0])),                   # bg0
        init(keys[4], (N_HIDDEN[0], N_HIDDEN[1])),         # wg1
        init(keys[5], (1, N_HIDDEN[1])),                   # bg1
        init(keys[6], (N_HIDDEN[0], ACTIVE_NODES)),        # p0 (soft-att projection)
        init(keys[7], (N_HIDDEN[1], ACTIVE_NODES)),        # p1
        init(keys[8], (CHANNEL, CONV_SIZE)),               # conv_1 weight (C,1,k) squeezed
        init(keys[9], (1, CHANNEL)),                       # conv_1 bias
        init(keys[10], (FC1_OUT, FC1_IN)),                 # fc_1 weight (out,in)
        init(keys[11], (1, FC1_OUT)),                      # fc_1 bias
        init(keys[12], (FC2_OUT, FC1_OUT)),                # fc_2 weight
        init(keys[13], (1, FC2_OUT)),                      # fc_2 bias
    )

    slab = pack_params(params)                             # hoisted, one-time packing
    out = wavegin_forward(adj, H, params[0], slab)
    out = jax.block_until_ready(out)

    ref = reference_forward(adj, H, params)
    assert out.shape == (B_TOTAL, FC2_OUT)
    assert jnp.allclose(out, ref, rtol=2e-2, atol=2e-2), (out, ref)

    print("KERNEL_OK")
</pallas_src>

<mosaic_0001>
module attributes {stable_mosaic.version = 11 : i64} {
  func.func @wavegin_kernel(%arg0: i32, %arg1: memref<8x16x16xbf16, #tpu.memory_space<vmem>>, %arg2: memref<8x16x128xbf16, #tpu.memory_space<vmem>>, %arg3: memref<2x128xf32, #tpu.memory_space<vmem>>, %arg4: memref<1216x128xbf16, #tpu.memory_space<vmem>>, %arg5: memref<8x128xf32, #tpu.memory_space<vmem>>) attributes {dimension_semantics = [#tpu.dimension_semantics<parallel>], iteration_bounds = array<i64: 2>, scalar_prefetch = 0 : i64, scratch_operands = 0 : i64, tpu.core_type = #tpu.core_type<tc>, window_params = [{transform_indices = @transform_0, window_bounds = array<i64: 8, 16, 16>}, {transform_indices = @transform_1, window_bounds = array<i64: 8, 16, 128>}, {pipeline_mode = #tpu.pipeline_mode<synchronous>, transform_indices = @transform_2, window_bounds = array<i64: 2, 128>}, {pipeline_mode = #tpu.pipeline_mode<synchronous>, transform_indices = @transform_3, window_bounds = array<i64: 1216, 128>}, {transform_indices = @transform_4, window_bounds = array<i64: 8, 128>}]} {
    %c0 = arith.constant 0 : index
    %c0_0 = arith.constant 0 : index
    %c0_1 = arith.constant 0 : index
    %0 = vector.load %arg1[%c0, %c0_0, %c0_1] : memref<8x16x16xbf16, #tpu.memory_space<vmem>>, vector<8x16x16xbf16>
    %c0_2 = arith.constant 0 : index
    %c0_3 = arith.constant 0 : index
    %c0_4 = arith.constant 0 : index
    %1 = vector.load %arg2[%c0_2, %c0_3, %c0_4] : memref<8x16x128xbf16, #tpu.memory_space<vmem>>, vector<8x16x128xbf16>
    %c0_5 = arith.constant 0 : index
    %c0_6 = arith.constant 0 : index
    %2 = vector.load %arg3[%c0_5, %c0_6] : memref<2x128xf32, #tpu.memory_space<vmem>>, vector<2x128xf32>
    %c0_7 = arith.constant 0 : index
    %c0_8 = arith.constant 0 : index
    %3 = vector.load %arg4[%c0_7, %c0_8] : memref<1216x128xbf16, #tpu.memory_space<vmem>>, vector<128x128xbf16>
    %c128 = arith.constant 128 : index
    %c0_9 = arith.constant 0 : index
    %4 = vector.load %arg4[%c128, %c0_9] : memref<1216x128xbf16, #tpu.memory_space<vmem>>, vector<1x128xbf16>
    %c136 = arith.constant 136 : index
    %c0_10 = arith.constant 0 : index
    %5 = vector.load %arg4[%c136, %c0_10] : memref<1216x128xbf16, #tpu.memory_space<vmem>>, vector<128x128xbf16>
    %c264 = arith.constant 264 : index
    %c0_11 = arith.constant 0 : index
    %6 = vector.load %arg4[%c264, %c0_11] : memref<1216x128xbf16, #tpu.memory_space<vmem>>, vector<1x128xbf16>
    %c272 = arith.constant 272 : index
    %c0_12 = arith.constant 0 : index
    %7 = vector.load %arg4[%c272, %c0_12] : memref<1216x128xbf16, #tpu.memory_space<vmem>>, vector<8x128xbf16>
    %c280 = arith.constant 280 : index
    %c0_13 = arith.constant 0 : index
    %8 = vector.load %arg4[%c280, %c0_13] : memref<1216x128xbf16, #tpu.memory_space<vmem>>, vector<8x128xbf16>
    %c288 = arith.constant 288 : index
    %c0_14 = arith.constant 0 : index
    %9 = vector.load %arg4[%c288, %c0_14] : memref<1216x128xbf16, #tpu.memory_space<vmem>>, vector<128x128xbf16>
    %c416 = arith.constant 416 : index
    %c0_15 = arith.constant 0 : index
    %10 = vector.load %arg4[%c416, %c0_15] : memref<1216x128xbf16, #tpu.memory_space<vmem>>, vector<128x128xbf16>
    %c544 = arith.constant 544 : index
    %c0_16 = arith.constant 0 : index
    %11 = vector.load %arg4[%c544, %c0_16] : memref<1216x128xbf16, #tpu.memory_space<vmem>>, vector<1x128xbf16>
    %c552 = arith.constant 552 : index
    %c0_17 = arith.constant 0 : index
    %12 = vector.load %arg4[%c552, %c0_17] : memref<1216x128xbf16, #tpu.memory_space<vmem>>, vector<512x128xbf16>
    %c1064 = arith.constant 1064 : index
    %c0_18 = arith.constant 0 : index
    %13 = vector.load %arg4[%c1064, %c0_18] : memref<1216x128xbf16, #tpu.memory_space<vmem>>, vector<1x128xbf16>
    %c1072 = arith.constant 1072 : index
    %c0_19 = arith.constant 0 : index
    %14 = vector.load %arg4[%c1072, %c0_19] : memref<1216x128xbf16, #tpu.memory_space<vmem>>, vector<128x128xbf16>
    %c1200 = arith.constant 1200 : index
    %c0_20 = arith.constant 0 : index
    %15 = vector.load %arg4[%c1200, %c0_20] : memref<1216x128xbf16, #tpu.memory_space<vmem>>, vector<1x128xbf16>
    %16 = vector.extract_strided_slice %2 {offsets = [0, 0], sizes = [1, 128], strides = [1, 1]} : vector<2x128xf32> to vector<1x128xf32>
    "tpu.trace_start"() <{level = 10 : i32, message = "gij,gjf->gif"}> : () -> ()
    %cst = arith.constant dense<0.000000e+00> : vector<8x16x128xf32>
    %17 = tpu.matmul %0, %1, %cst {dimension_numbers = #tpu.dot_dimension_numbers<[2], [1], [1], [2], [0, 0, 0, 1, 1, 2], [0], [0]>} : vector<8x16x16xbf16>, vector<8x16x128xbf16>, vector<8x16x128xf32> -> vector<8x16x128xf32>
    "tpu.trace_stop"() : () -> ()
    %18 = arith.extf %1 : vector<8x16x128xbf16> to vector<8x16x128xf32>
    %19 = vector.shape_cast %16 : vector<1x128xf32> to vector<1x1x128xf32>
    %20 = vector.broadcast %19 : vector<1x1x128xf32> to vector<8x16x128xf32>
    %21 = arith.mulf %20, %18 : vector<8x16x128xf32>
    %22 = arith.addf %17, %21 : vector<8x16x128xf32>
    %23 = arith.truncf %22 : vector<8x16x128xf32> to vector<8x16x128xbf16>
    %24 = vector.shape_cast %23 : vector<8x16x128xbf16> to vector<128x128xbf16>
    %cst_21 = arith.constant dense<0.000000e+00> : vector<128x128xf32>
    %25 = tpu.matmul %24, %3, %cst_21 {dimension_numbers = #tpu.dot_dimension_numbers<[1], [0], [0], [1], [0, 0, 1, 1], [], []>} : vector<128x128xbf16>, vector<128x128xbf16>, vector<128x128xf32> -> vector<128x128xf32>
    %26 = arith.extf %4 : vector<1x128xbf16> to vector<1x128xf32>
    %27 = vector.broadcast %26 : vector<1x128xf32> to vector<128x128xf32>
    %28 = arith.addf %25, %27 : vector<128x128xf32>
    %cst_22 = arith.constant 0.000000e+00 : f32
    %29 = vector.broadcast %cst_22 : f32 to vector<128x128xf32>
    %30 = arith.maximumf %28, %29 : vector<128x128xf32>
    %31 = arith.truncf %30 : vector<128x128xf32> to vector<128x128xbf16>
    %32 = vector.shape_cast %31 : vector<128x128xbf16> to vector<8x16x128xbf16>
    %33 = vector.extract_strided_slice %2 {offsets = [1, 0], sizes = [1, 128], strides = [1, 1]} : vector<2x128xf32> to vector<1x128xf32>
    "tpu.trace_start"() <{level = 10 : i32, message = "gij,gjf->gif"}> : () -> ()
    %cst_23 = arith.constant dense<0.000000e+00> : vector<8x16x128xf32>
    %34 = tpu.matmul %0, %32, %cst_23 {dimension_numbers = #tpu.dot_dimension_numbers<[2], [1], [1], [2], [0, 0, 0, 1, 1, 2], [0], [0]>} : vector<8x16x16xbf16>, vector<8x16x128xbf16>, vector<8x16x128xf32> -> vector<8x16x128xf32>
    "tpu.trace_stop"() : () -> ()
    %35 = arith.extf %32 : vector<8x16x128xbf16> to vector<8x16x128xf32>
    %36 = vector.shape_cast %33 : vector<1x128xf32> to vector<1x1x128xf32>
    %37 = vector.broadcast %36 : vector<1x1x128xf32> to vector<8x16x128xf32>
    %38 = arith.mulf %37, %35 : vector<8x16x128xf32>
    %39 = arith.addf %34, %38 : vector<8x16x128xf32>
    %40 = arith.truncf %39 : vector<8x16x128xf32> to vector<8x16x128xbf16>
    %41 = vector.shape_cast %40 : vector<8x16x128xbf16> to vector<128x128xbf16>
    %cst_24 = arith.constant dense<0.000000e+00> : vector<128x128xf32>
    %42 = tpu.matmul %41, %5, %cst_24 {dimension_numbers = #tpu.dot_dimension_numbers<[1], [0], [0], [1], [0, 0, 1, 1], [], []>} : vector<128x128xbf16>, vector<128x128xbf16>, vector<128x128xf32> -> vector<128x128xf32>
    %43 = arith.extf %6 : vector<1x128xbf16> to vector<1x128xf32>
    %44 = vector.broadcast %43 : vector<1x128xf32> to vector<128x128xf32>
    %45 = arith.addf %42, %44 : vector<128x128xf32>
    %cst_25 = arith.constant 0.000000e+00 : f32
    %46 = vector.broadcast %cst_25 : f32 to vector<128x128xf32>
    %47 = arith.maximumf %45, %46 : vector<128x128xf32>
    %48 = arith.truncf %47 : vector<128x128xf32> to vector<128x128xbf16>
    %49 = vector.shape_cast %48 : vector<128x128xbf16> to vector<8x16x128xbf16>
    %50 = vector.shape_cast %7 : vector<8x128xbf16> to vector<1x8x128xbf16>
    %51 = vector.broadcast %50 : vector<1x8x128xbf16> to vector<8x8x128xbf16>
    "tpu.trace_start"() <{level = 10 : i32, message = "gkf,gnf->gkn"}> : () -> ()
    %cst_26 = arith.constant dense<0.000000e+00> : vector<8x8x16xf32>
    %52 = tpu.matmul %51, %32, %cst_26 {dimension_numbers = #tpu.dot_dimension_numbers<[2], [2], [1], [1], [0, 0, 0, 1, 1, 1], [0], [0]>} : vector<8x8x128xbf16>, vector<8x16x128xbf16>, vector<8x8x16xf32> -> vector<8x8x16xf32>
    "tpu.trace_stop"() : () -> ()
    %cst_27 = arith.constant dense<0xFF800000> : vector<8x8xf32>
    %53 = vector.multi_reduction <maximumf>, %52, %cst_27 [2] : vector<8x8x16xf32> to vector<8x8xf32>
    %54 = vector.shape_cast %53 : vector<8x8xf32> to vector<8x8x1xf32>
    %55 = vector.broadcast %54 : vector<8x8x1xf32> to vector<8x8x16xf32>
    %56 = arith.subf %52, %55 : vector<8x8x16xf32>
    %57 = math.exp %56 : vector<8x8x16xf32>
    %cst_28 = arith.constant dense<0.000000e+00> : vector<8x8xf32>
    %58 = vector.multi_reduction <add>, %57, %cst_28 [2] : vector<8x8x16xf32> to vector<8x8xf32>
    %59 = vector.shape_cast %58 : vector<8x8xf32> to vector<8x8x1xf32>
    %60 = tpu.reciprocal %59 {approx = true} : vector<8x8x1xf32> -> vector<8x8x1xf32>
    %61 = vector.broadcast %60 : vector<8x8x1xf32> to vector<8x8x16xf32>
    %62 = arith.mulf %57, %61 : vector<8x8x16xf32>
    %63 = arith.truncf %62 : vector<8x8x16xf32> to vector<8x8x16xbf16>
    "tpu.trace_start"() <{level = 10 : i32, message = "gkn,gnf->gkf"}> : () -> ()
    %cst_29 = arith.constant dense<0.000000e+00> : vector<8x8x128xf32>
    %64 = tpu.matmul %63, %32, %cst_29 {dimension_numbers = #tpu.dot_dimension_numbers<[2], [1], [1], [2], [0, 0, 0, 1, 1, 2], [0], [0]>} : vector<8x8x16xbf16>, vector<8x16x128xbf16>, vector<8x8x128xf32> -> vector<8x8x128xf32>
    "tpu.trace_stop"() : () -> ()
    %65 = vector.shape_cast %64 : vector<8x8x128xf32> to vector<64x128xf32>
    %66 = arith.truncf %65 : vector<64x128xf32> to vector<64x128xbf16>
    %67 = vector.shape_cast %8 : vector<8x128xbf16> to vector<1x8x128xbf16>
    %68 = vector.broadcast %67 : vector<1x8x128xbf16> to vector<8x8x128xbf16>
    "tpu.trace_start"() <{level = 10 : i32, message = "gkf,gnf->gkn"}> : () -> ()
    %cst_30 = arith.constant dense<0.000000e+00> : vector<8x8x16xf32>
    %69 = tpu.matmul %68, %49, %cst_30 {dimension_numbers = #tpu.dot_dimension_numbers<[2], [2], [1], [1], [0, 0, 0, 1, 1, 1], [0], [0]>} : vector<8x8x128xbf16>, vector<8x16x128xbf16>, vector<8x8x16xf32> -> vector<8x8x16xf32>
    "tpu.trace_stop"() : () -> ()
    %cst_31 = arith.constant dense<0xFF800000> : vector<8x8xf32>
    %70 = vector.multi_reduction <maximumf>, %69, %cst_31 [2] : vector<8x8x16xf32> to vector<8x8xf32>
    %71 = vector.shape_cast %70 : vector<8x8xf32> to vector<8x8x1xf32>
    %72 = vector.broadcast %71 : vector<8x8x1xf32> to vector<8x8x16xf32>
    %73 = arith.subf %69, %72 : vector<8x8x16xf32>
    %74 = math.exp %73 : vector<8x8x16xf32>
    %cst_32 = arith.constant dense<0.000000e+00> : vector<8x8xf32>
    %75 = vector.multi_reduction <add>, %74, %cst_32 [2] : vector<8x8x16xf32> to vector<8x8xf32>
    %76 = vector.shape_cast %75 : vector<8x8xf32> to vector<8x8x1xf32>
    %77 = tpu.reciprocal %76 {approx = true} : vector<8x8x1xf32> -> vector<8x8x1xf32>
    %78 = vector.broadcast %77 : vector<8x8x1xf32> to vector<8x8x16xf32>
    %79 = arith.mulf %74, %78 : vector<8x8x16xf32>
    %80 = arith.truncf %79 : vector<8x8x16xf32> to vector<8x8x16xbf16>
    "tpu.trace_start"() <{level = 10 : i32, message = "gkn,gnf->gkf"}> : () -> ()
    %cst_33 = arith.constant dense<0.000000e+00> : vector<8x8x128xf32>
    %81 = tpu.matmul %80, %49, %cst_33 {dimension_numbers = #tpu.dot_dimension_numbers<[2], [1], [1], [2], [0, 0, 0, 1, 1, 2], [0], [0]>} : vector<8x8x16xbf16>, vector<8x16x128xbf16>, vector<8x8x128xf32> -> vector<8x8x128xf32>
    "tpu.trace_stop"() : () -> ()
    %82 = vector.shape_cast %81 : vector<8x8x128xf32> to vector<64x128xf32>
    %83 = arith.truncf %82 : vector<64x128xf32> to vector<64x128xbf16>
    %cst_34 = arith.constant dense<0.000000e+00> : vector<64x128xf32>
    %84 = tpu.matmul %66, %9, %cst_34 {dimension_numbers = #tpu.dot_dimension_numbers<[1], [0], [0], [1], [0, 0, 1, 1], [], []>} : vector<64x128xbf16>, vector<128x128xbf16>, vector<64x128xf32> -> vector<64x128xf32>
    %cst_35 = arith.constant dense<0.000000e+00> : vector<64x128xf32>
    %85 = tpu.matmul %83, %10, %cst_35 {dimension_numbers = #tpu.dot_dimension_numbers<[1], [0], [0], [1], [0, 0, 1, 1], [], []>} : vector<64x128xbf16>, vector<128x128xbf16>, vector<64x128xf32> -> vector<64x128xf32>
    %86 = arith.addf %84, %85 : vector<64x128xf32>
    %87 = arith.extf %11 : vector<1x128xbf16> to vector<1x128xf32>
    %88 = vector.broadcast %87 : vector<1x128xf32> to vector<64x128xf32>
    %89 = arith.addf %86, %88 : vector<64x128xf32>
    %cst_36 = arith.constant 0.000000e+00 : f32
    %90 = vector.broadcast %cst_36 : f32 to vector<64x128xf32>
    %91 = arith.maximumf %89, %90 : vector<64x128xf32>
    %92 = arith.truncf %91 : vector<64x128xf32> to vector<64x128xbf16>
    %93 = vector.shape_cast %92 : vector<64x128xbf16> to vector<8x8x128xbf16>
    %94 = vector.extract_strided_slice %93 {offsets = [0, 0, 0], sizes = [8, 1, 128], strides = [1, 1, 1]} : vector<8x8x128xbf16> to vector<8x1x128xbf16>
    %95 = vector.shape_cast %94 : vector<8x1x128xbf16> to vector<8x128xbf16>
    %96 = vector.extract_strided_slice %93 {offsets = [0, 1, 0], sizes = [8, 1, 128], strides = [1, 1, 1]} : vector<8x8x128xbf16> to vector<8x1x128xbf16>
    %97 = vector.shape_cast %96 : vector<8x1x128xbf16> to vector<8x128xbf16>
    %98 = vector.extract_strided_slice %93 {offsets = [0, 2, 0], sizes = [8, 1, 128], strides = [1, 1, 1]} : vector<8x8x128xbf16> to vector<8x1x128xbf16>
    %99 = vector.shape_cast %98 : vector<8x1x128xbf16> to vector<8x128xbf16>
    %100 = vector.extract_strided_slice %93 {offsets = [0, 3, 0], sizes = [8, 1, 128], strides = [1, 1, 1]} : vector<8x8x128xbf16> to vector<8x1x128xbf16>
    %101 = vector.shape_cast %100 : vector<8x1x128xbf16> to vector<8x128xbf16>
    %102 = tpu.concatenate %95, %97, %99, %101 in 1 : vector<8x128xbf16>, vector<8x128xbf16>, vector<8x128xbf16>, vector<8x128xbf16> -> vector<8x512xbf16>
    %cst_37 = arith.constant dense<0.000000e+00> : vector<8x128xf32>
    %103 = tpu.matmul %102, %12, %cst_37 {dimension_numbers = #tpu.dot_dimension_numbers<[1], [0], [0], [1], [0, 0, 1, 1], [], []>} : vector<8x512xbf16>, vector<512x128xbf16>, vector<8x128xf32> -> vector<8x128xf32>
    %104 = arith.extf %13 : vector<1x128xbf16> to vector<1x128xf32>
    %105 = vector.broadcast %104 : vector<1x128xf32> to vector<8x128xf32>
    %106 = arith.addf %103, %105 : vector<8x128xf32>
    %cst_38 = arith.constant 0.000000e+00 : f32
    %107 = vector.broadcast %cst_38 : f32 to vector<8x128xf32>
    %108 = arith.maximumf %106, %107 : vector<8x128xf32>
    %109 = arith.truncf %108 : vector<8x128xf32> to vector<8x128xbf16>
    %cst_39 = arith.constant dense<0.000000e+00> : vector<8x128xf32>
    %110 = tpu.matmul %109, %14, %cst_39 {dimension_numbers = #tpu.dot_dimension_numbers<[1], [0], [0], [1], [0, 0, 1, 1], [], []>} : vector<8x128xbf16>, vector<128x128xbf16>, vector<8x128xf32> -> vector<8x128xf32>
    %111 = arith.extf %15 : vector<1x128xbf16> to vector<1x128xf32>
    %112 = vector.broadcast %111 : vector<1x128xf32> to vector<8x128xf32>
    %113 = arith.addf %110, %112 : vector<8x128xf32>
    %cst_40 = arith.constant 0.000000e+00 : f32
    %114 = vector.broadcast %cst_40 : f32 to vector<8x128xf32>
    %115 = arith.subf %114, %113 : vector<8x128xf32>
    %116 = math.exp %115 : vector<8x128xf32>
    %cst_41 = arith.constant 1.000000e+00 : f32
    %117 = vector.broadcast %cst_41 : f32 to vector<8x128xf32>
    %118 = arith.addf %117, %116 : vector<8x128xf32>
    %cst_42 = arith.constant 1.000000e+00 : f32
    %119 = vector.broadcast %cst_42 : f32 to vector<8x128xf32>
    %120 = arith.divf %119, %118 : vector<8x128xf32>
    %c0_43 = arith.constant 0 : index
    %c0_44 = arith.constant 0 : index
    %121 = vector.load %arg5[%c0_43, %c0_44] : memref<8x128xf32, #tpu.memory_space<vmem>>, vector<8x128xf32>
    tpu.vector_store %arg5[%c0_43, %c0_44], %120 {strides = array<i32>} : memref<8x128xf32, #tpu.memory_space<vmem>>, vector<8x128xf32>,
    return
  }
  func.func @transform_0(%arg0: i32) -> (i32, i32, i32) {
    %c0_i32 = arith.constant 0 : i32
    %c0_i32_0 = arith.constant 0 : i32
    %c0_i32_1 = arith.constant 0 : i32
    return %arg0, %c0_i32, %c0_i32_0 : i32, i32, i32
  }
  func.func @transform_1(%arg0: i32) -> (i32, i32, i32) {
    %c0_i32 = arith.constant 0 : i32
    %c0_i32_0 = arith.constant 0 : i32
    %c0_i32_1 = arith.constant 0 : i32
    return %arg0, %c0_i32, %c0_i32_0 : i32, i32, i32
  }
  func.func @transform_2(%arg0: i32) -> (i32, i32) {
    %c0_i32 = arith.constant 0 : i32
    %c0_i32_0 = arith.constant 0 : i32
    %c0_i32_1 = arith.constant 0 : i32
    return %c0_i32, %c0_i32_0 : i32, i32
  }
  func.func @transform_3(%arg0: i32) -> (i32, i32) {
    %c0_i32 = arith.constant 0 : i32
    %c0_i32_0 = arith.constant 0 : i32
    %c0_i32_1 = arith.constant 0 : i32
    return %c0_i32, %c0_i32_0 : i32, i32
  }
  func.func @transform_4(%arg0: i32) -> (i32, i32) {
    %c0_i32 = arith.constant 0 : i32
    %c0_i32_0 = arith.constant 0 : i32
    return %arg0, %c0_i32 : i32, i32
  }
}

</mosaic_0001>

<bundles_post_ra>
// kernel: wavegin_forward.1
= control target key start
LH: loop header
LB: loop body
LE: loop exit
PB: predicated region body
PF: predicated region fallthrough
CT: control target
= control target key end

     0   :  { %s4932_s15 = smov 0   ;;  %s5811_s0 = inlined_call_operand.vmem [shape: bf16[16,16,16], index: 0, kind: input, shape index: {}]   ;;  %s5812_s1 = inlined_call_operand.vmem [shape: bf16[16,16,128], index: 1, kind: input, shape index: {}]   ;;  %s5813_s2 = inlined_call_operand.vmem [shape: f32[2,128], index: 2, kind: input, shape index: {}]   ;;  %s5814_s3 = inlined_call_operand.vmem [shape: bf16[1216,128], index: 3, kind: input, shape index: {}]   ;;  %s5815_s4 = inlined_call_operand.vmem [shape: f32[16,128], index: 4, kind: output, shape index: {}]  }
   0x1 LB: > { %s4938_s16 = sadd.s32 4294967295, %s4903_s15   ;;  %p3942_p0 = scmp.ge.s32.totalorder %s4903_s15, 1  ;;  %s4903_s15 = sphi %s4932_s15, %s14_s15  }
   0x2   : > { %p176_p1 = scmp.lt.s32.totalorder %s4903_s15, 3 }
   0x4   : > { %p177_p2 = pnand %p3942_p0, %p176_p1 }
   0x5   : > { %s3943_s17 = sshll.u32 (!%p177_p2), %s4938_s16, 3  ;;  %v4905_v0 = vmov (!%p177_p2), 0.0   ;;  %vm4906_vm0 = vmmov (!%p177_p2), 0   ;;  %vm458_vm1 = vcmask (!%p177_p2), 130048   ;;  %v4749_v8 = vld [vmem:[%s5814_s3] sm:$0xff] (!%p177_p2)   ;;  %v4750_v12 = vld [vmem:[%s5814_s3 + $0x8] sm:$0xff] (!%p177_p2)   ;;  %v427_v25 = vlaneseq (!%p177_p2) }
   0x6   : > { %180 = sbr.rel (%p177_p2) target bundleno = 2800 (0xaf0), region = 36  ;;  %4295 = vmatprep.subr.bf16.mxu1 (!%p177_p2), %v4905_v0  ;;  %p209_p3 = scmp.lt.s32.totalorder (!%p177_p2), %s3943_s17, 15  ;;  %4297 = vmatprep.mubr.msk.bf16.mxu1 (!%p177_p2), %vm4906_vm0, %v4905_v0  ;;  %v4751_v14 = vld [vmem:[%s5814_s3 + $0x10] sm:$0xff] (!%p177_p2)   ;;  %v4752_v16 = vld [vmem:[%s5814_s3 + $0x18] sm:$0xff] (!%p177_p2)   ;;  %v4753_v18 = vld [vmem:[%s5814_s3 + $0x20] sm:$0xff] (!%p177_p2)   ;;  %vm3424_vm2 = vcmask (!%p177_p2), 1041409  }
   0x7   : > { %4319 = vmatprep.subr.bf16.mxu0 (!%p177_p2), %v4905_v0  ;;  %4321 = vmatprep.mubr.msk.bf16.mxu0 (!%p177_p2), %vm4906_vm0, %v4905_v0  ;;  %v4754_v22 = vld [vmem:[%s5814_s3 + $0x28] sm:$0xff] (!%p177_p2)   ;;  %v4755_v23 = vld [vmem:[%s5814_s3 + $0x30] sm:$0xff] (!%p177_p2)   ;;  %v4756_v24 = vld [vmem:[%s5814_s3 + $0x38] sm:$0xff] (!%p177_p2)   ;;  %v5077_v26 = vshrl.u32 (!%p177_p2), %v427_v25, 7  ;;  %vm3427_vm3 = vcmask (!%p177_p2), 1042434   ;;  %vm3430_vm4 = vcmask (!%p177_p2), 1043459  }
   0x8   : > { %v5085_v28 = vld [vmem:[%s5813_s2] sm:$0x3] (!%p177_p2)  ;;  %vm3433_vm5 = vcmask (!%p177_p2), 1044484   ;;  %vm3436_vm6 = vcmask (!%p177_p2), 1045509   ;;  %vm3439_vm7 = vcmask (!%p177_p2), 1046534   ;;  %vm3442_vm8 = vcmask (!%p177_p2), 1047559  }
   0x9   : > { %v5080_v27 = vsub.s32 (!%p177_p2), 0, %v5077_v26  ;;  %p222_p4 = scmp.lt.s32.totalorder (!%p177_p2), %s4938_s16, 1 }
   0xb   : > { %v5090_v30 = vrot.slane (!%p177_p2), %v5085_v28, %v5080_v27 }
   0xd   : > { %s5817_s17 = smov (!%p209_p3, %s3943_s17), 15  ;;  %s5819_s16 = smov (!%p222_p4, %s4938_s16), 1 }
   0xe   : > { %s4080_s18 = sshll.u32 %s5817_s17, 3  ;;  %s3949_s17 = sshll.u32 %s5819_s16, 3 }
   0xf   : > { %s4952_s21 = scalar_lea.vmem %s5811_s0, %s4080_s18  ;;  %s4957_s24 = scalar_lea.vmem %s5812_s1, %s4080_s18 }
  0x10   : > { %v4960_v1 = vld [vmem:[%s4957_s24] sm:$0xff]   ;;  %v4963_v2 = vld [vmem:[%s4957_s24 + $0x8] sm:$0xff]   ;;  %v4976_v5 = vld [vmem:[%s4957_s24 + $0x10] sm:$0xff]   ;;  %s225_s20 = scalar_lea.vmem %s5815_s4, %s3949_s17 }
  0x11   : > { %v4966_v3 = vld [vmem:[%s4952_s21] sm:$0xff]   ;;  %4296 = vmatpush3.bf16.msra.mxu1 %v4960_v1  ;;  %v4987_v7 = vld [vmem:[%s4957_s24 + $0x30] sm:$0xff]   ;;  %v4994_v9 = vld [vmem:[%s4952_s21 + $0x8] sm:$0xff]   ;;  %v411_v29 = vunpack.c.l.bf16 %v4960_v1  ;;  %v412_v31 = vunpack.c.h.bf16 %v4960_v1  ;;  %v413_v43 = vunpack.c.l.bf16 %v4963_v2  ;;  %v414_v44 = vunpack.c.h.bf16 %v4963_v2 }
  0x12   : > { %4301 = vmatprep.subr.bf16.mxu1 %v4905_v0  ;;  %v4971_v4 = vld [vmem:[%s4957_s24 + $0x20] sm:$0xff]   ;;  %v5002_v10 = vld [vmem:[%s4952_s21 + $0x30] sm:$0xff]   ;;  %v5007_v11 = vld [vmem:[%s4957_s24 + $0x18] sm:$0xff]   ;;  %v423_v50 = vunpack.c.l.bf16 %v4987_v7  ;;  %v424_v57 = vunpack.c.h.bf16 %v4987_v7 }
  0x13   : > { %v4982_v6 = vld [vmem:[%s4952_s21 + $0x20] sm:$0xff]   ;;  %4320 = vmatpush3.bf16.msra.mxu0 %v4971_v4  ;;  %v5016_v13 = vld [vmem:[%s4952_s21 + $0x10] sm:$0xff]   ;;  %v5027_v15 = vld [vmem:[%s4957_s24 + $0x28] sm:$0xff]   ;;  %v431_v32 = vmul.f32 %v5090_v30, %v411_v29  ;;  %v419_v33 = vunpack.c.l.bf16 %v4971_v4  ;;  %v432_v34 = vmul.f32 %v5090_v30, %v412_v31  ;;  %v420_v35 = vunpack.c.h.bf16 %v4971_v4 }
  0x14   : > { %4298 = vmatmul.mubr.msk.bf16.vlgmr.msra.gmra.mrb[0].mxu1 %vm458_vm1, %v4966_v3  ;;  %4331 = vmatprep.subr.bf16.mxu0 %v4905_v0  ;;  %v5036_v17 = vld [vmem:[%s4952_s21 + $0x18] sm:$0xff]   ;;  %v5051_v20 = vld [vmem:[%s4952_s21 + $0x28] sm:$0xff]   ;;  %v433_v51 = vmul.f32 %v5090_v30, %v413_v43  ;;  %v434_v52 = vmul.f32 %v5090_v30, %v414_v44  ;;  %v443_v61 = vmul.f32 %v5090_v30, %v423_v50  ;;  %v416_v4 = vunpack.c.h.bf16 %v4976_v5 }
  0x15   : > { %4302 = vmatpush3.bf16.msra.mxu1 %v4963_v2  ;;  %4303 = vmatprep.mubr.msk.bf16.mxu1 %vm4906_vm0, %v4905_v0  ;;  %v5045_v19 = vld [vmem:[%s4957_s24 + $0x38] sm:$0xff]   ;;  %v439_v40 = vmul.f32 %v5090_v30, %v419_v33  ;;  %v440_v45 = vmul.f32 %v5090_v30, %v420_v35  ;;  %v415_v2 = vunpack.c.l.bf16 %v4976_v5  ;;  %v421_v43 = vunpack.c.l.bf16 %v5027_v15 }
  0x16   : > { %4307 = vmatprep.subr.bf16.mxu1 %v4905_v0  ;;  %4322 = vmatmul.mubr.msk.bf16.vlgmr.msra.gmra.mrb[0].mxu0 %vm458_vm1, %v4982_v6  ;;  %v5060_v21 = vld [vmem:[%s4952_s21 + $0x38] sm:$0xff]  }
  0x17   : > { %4332 = vmatpush3.bf16.msra.mxu0 %v4987_v7  ;;  %4333 = vmatprep.mubr.msk.bf16.mxu0 %vm4906_vm0, %v4905_v0  ;;  %v435_v7 = vmul.f32 %v5090_v30, %v415_v2  ;;  %v441_v50 = vmul.f32 %v5090_v30, %v421_v43 }
  0x18   : > { %4343 = vmatprep.subr.bf16.mxu0 %v4749_v8 }
  0x1c   : > { %4304 = vmatmul.mubr.msk.bf16.vlgmr.msra.gmra.mrb[4].mxu1 %vm458_vm1, %v4994_v9 }
  0x1d   : > { %4308 = vmatpush3.bf16.msra.mxu1 %v4976_v5  ;;  %4309 = vmatprep.mubr.msk.bf16.mxu1 %vm4906_vm0, %v4905_v0 }
  0x1e   : > { %4313 = vmatprep.subr.bf16.mxu1 %v4905_v0  ;;  %4334 = vmatmul.mubr.msk.bf16.vlgmr.msra.gmra.mrb[4].mxu0 %vm458_vm1, %v5002_v10 }
  0x1f   : > { %4344 = vmatpush3.bf16.msra.mxu0 %v4749_v8  ;;  %v444_v8 = vmul.f32 %v5090_v30, %v424_v57 }
  0x20   : > { %4345 = vmatprep.subr.bf16.mxu0 %v4750_v12 }
  0x23   : > { %4346 = vmatpush3.bf16.msra.mxu0 %v4750_v12 }
  0x24   : > { %4310 = vmatmul.mubr.msk.bf16.vlgmr.msra.gmra.mrb[8].mxu1 %vm458_vm1, %v5016_v13  ;;  %4347 = vmatprep.subr.bf16.mxu0 %v4751_v14 }
  0x25   : > { %4314 = vmatpush3.bf16.msra.mxu1 %v5007_v11  ;;  %4315 = vmatprep.mubr.msk.bf16.mxu1 %vm4906_vm0, %v4905_v0 }
  0x26   : > { %4325 = vmatprep.subr.bf16.mxu1 %v4905_v0 }
  0x27   : > { %4348 = vmatpush3.bf16.msra.mxu0 %v4751_v14 }
  0x28   : > { %4349 = vmatprep.subr.bf16.mxu0 %v4752_v16 }
  0x2b   : > { %4350 = vmatpush3.bf16.msra.mxu0 %v4752_v16 }
  0x2c   : > { %4316 = vmatmul.mubr.msk.bf16.vlgmr.msra.gmra.mrb[12].mxu1 %vm458_vm1, %v5036_v17  ;;  %4351 = vmatprep.subr.bf16.mxu0 %v4753_v18 }
  0x2d   : > { %4326 = vmatpush3.bf16.msra.mxu1 %v5027_v15  ;;  %4327 = vmatprep.mubr.msk.bf16.mxu1 %vm4906_vm0, %v4905_v0 }
  0x2e   : > { %4337 = vmatprep.subr.bf16.mxu1 %v4905_v0 }
  0x2f   : > { %4352 = vmatpush3.bf16.msra.mxu0 %v4753_v18 }
  0x30   : > { %4353 = vmatprep.subr.bf16.mxu0 %v4754_v22 }
  0x33   : > { %4354 = vmatpush3.bf16.msra.mxu0 %v4754_v22  ;;  %v436_v22 = vmul.f32 %v5090_v30, %v416_v4 }
  0x34   : > { %4328 = vmatmul.mubr.msk.bf16.vlgmr.msra.gmra.mrb[16].mxu1 %vm458_vm1, %v5051_v20  ;;  %4355 = vmatprep.subr.bf16.mxu0 %v4755_v23 }
  0x35   : > { %4338 = vmatpush3.bf16.msra.mxu1 %v5045_v19  ;;  %4339 = vmatprep.mubr.msk.bf16.mxu1 %vm4906_vm0, %v4905_v0 }
  0x36   : > { %4375 = vmatprep.subr.bf16.mxu1 %v4905_v0 }
  0x37   : > { %4356 = vmatpush3.bf16.msra.mxu0 %v4755_v23 }
  0x38   : > { %4357 = vmatprep.subr.bf16.mxu0 %v4756_v24 }
  0x3b   : > { %4358 = vmatpush3.bf16.msra.mxu0 %v4756_v24 }
  0x3c   : > { %4340 = vmatmul.mubr.msk.bf16.vlgmr.msra.gmra.mrb[20].mxu1 %vm458_vm1, %v5060_v21  ;;  %4417 = vmatprep.subr.bf16.mxu0 %v4905_v0 }
  0x3d   : > { %4377 = vmatprep.mubr.msk.bf16.mxu1 %vm4906_vm0, %v4905_v0 }
  0xe7   : > { %v496_v36 = vpop.f32.mrb[0].mxu1 }
  0xe8   : > { %v497_v37 = vadd.f32 %v496_v36, %v431_v32  ;;  %v4299_v38 = vpop.f32.mrb[1].mxu1  ;;  %v417_v36 = vunpack.c.l.bf16 %v5007_v11 }
  0xe9   : > { %v499_v39 = vpop.f32.mrb[2].mxu1  ;;  %v716_v47 = vpop.f32.mrb[0].mxu0 }
  0xea   : > { %v500_v41 = vadd.f32 %v499_v39, %v432_v34  ;;  %v4300_v42 = vpop.f32.mrb[3].mxu1  ;;  %v717_v48 = vadd.f32 %v716_v47, %v439_v40  ;;  %v4323_v49 = vpop.f32.mrb[1].mxu0  ;;  %v437_v39 = vmul.f32 %v5090_v30, %v417_v36 }
  0xeb   : > { %v719_v53 = vpop.f32.mrb[2].mxu0 }
  0xec   : > { %v888_v46 = vpack.c.bf16 %v500_v41, %v497_v37  ;;  %v720_v55 = vadd.f32 %v719_v53, %v440_v45  ;;  %v4324_v56 = vpop.f32.mrb[3].mxu0  ;;  %v418_v37 = vunpack.c.h.bf16 %v5007_v11 }
  0xee   : > { %4359 = vmatprep.mubr.bf16.mxu0 %v888_v46  ;;  %v892_v60 = vpack.c.bf16 %v720_v55, %v717_v48  ;;  %v438_v40 = vmul.f32 %v5090_v30, %v418_v37  ;;  %v422_v48 = vunpack.c.h.bf16 %v5027_v15 }
  0xef   : > { %v551_v54 = vpop.f32.mrb[4].mxu1 }
  0xf0   : > { %v4305_v58 = vpop.f32.mrb[5].mxu1  ;;  %v552_v62 = vadd.f32 %v551_v54, %v433_v51  ;;  %v442_v11 = vmul.f32 %v5090_v30, %v422_v48  ;;  %v425_v54 = vunpack.c.l.bf16 %v5045_v19 }
  0xf1   : > { %v554_v59 = vpop.f32.mrb[6].mxu1  ;;  %v826_v14 = vpop.f32.mrb[4].mxu0  ;;  %v426_v58 = vunpack.c.h.bf16 %v5045_v19  ;;  %v276_v19 = vld [vmem:[%s5814_s3 + $0x40] sm:$0x1] }
  0xf2   : > { %v555_v63 = vadd.f32 %v554_v59, %v434_v52  ;;  %v4306_v1 = vpop.f32.mrb[7].mxu1  ;;  %v827_v16 = vadd.f32 %v826_v14, %v443_v61  ;;  %v4335_v18 = vpop.f32.mrb[5].mxu0  ;;  %v445_v15 = vmul.f32 %v5090_v30, %v425_v54 }
  0xf3   : > { %v829_v23 = vpop.f32.mrb[6].mxu0  ;;  %v446_v61 = vmul.f32 %v5090_v30, %v426_v58 }
  0xf4   : > { %v889_v12 = vpack.c.bf16 %v555_v63, %v552_v62  ;;  %v830_v25 = vadd.f32 %v829_v23, %v444_v8  ;;  %v4336_v29 = vpop.f32.mrb[7].mxu0 }
  0xf6   : > { %4360 = vmatmul.mubr.bf16.vlgmr.msra.gmra.mrb[8].mxu0 %v889_v12  ;;  %v894_v33 = vpack.c.bf16 %v830_v25, %v827_v16  ;;  %v896_v12 = vunpack.c.l.bf16 %v276_v19 }
  0xf7   : > { %v606_v24 = vpop.f32.mrb[8].mxu1 }
  0xf8   : > { %v4311_v31 = vpop.f32.mrb[9].mxu1  ;;  %v607_v34 = vadd.f32 %v606_v24, %v435_v7  ;;  %v5129_v14 = vrot.slane %v896_v12, %v5080_v27 }
  0xf9   : > { %v609_v32 = vpop.f32.mrb[10].mxu1 }
  0xfa   : > { %v610_v5 = vadd.f32 %v609_v32, %v436_v22  ;;  %v4312_v35 = vpop.f32.mrb[11].mxu1 }
  0xfc   : > { %v890_v38 = vpack.c.bf16 %v610_v5, %v607_v34 }
  0xfe   : > { %4363 = vmatprep.mubr.bf16.mxu0 %v890_v38 }
  0xff   : > { %v661_v41 = vpop.f32.mrb[12].mxu1 }
 0x100   : > { %v4317_v42 = vpop.f32.mrb[13].mxu1  ;;  %v662_v45 = vadd.f32 %v661_v41, %v437_v39 }
 0x101   : > { %v664_v44 = vpop.f32.mrb[14].mxu1 }
 0x102   : > { %v665_v46 = vadd.f32 %v664_v44, %v438_v40  ;;  %v4318_v47 = vpop.f32.mrb[15].mxu1 }
 0x104   : > { %v891_v49 = vpack.c.bf16 %v665_v46, %v662_v45 }
 0x106   : > { %4364 = vmatmul.mubr.bf16.gmra.mrb[12].mxu0 %v891_v49 }
 0x107   : > { %v771_v51 = vpop.f32.mrb[16].mxu1  ;;  %4367 = vmatprep.mubr.bf16.mxu0 %v892_v60 }
 0x108   : > { %v772_v52 = vadd.f32 %v771_v51, %v441_v50  ;;  %v4329_v53 = vpop.f32.mrb[17].mxu1 }
 0x109   : > { %v774_v55 = vpop.f32.mrb[18].mxu1 }
 0x10a   : > { %v775_v56 = vadd.f32 %v774_v55, %v442_v11  ;;  %v4330_v57 = vpop.f32.mrb[19].mxu1 }
 0x10c   : > { %v893_v59 = vpack.c.bf16 %v775_v56, %v772_v52 }
 0x10e   : > { %4368 = vmatmul.mubr.bf16.gmra.mrb[16].mxu0 %v893_v59 }
 0x10f   : > { %v881_v62 = vpop.f32.mrb[20].mxu1  ;;  %4371 = vmatprep.mubr.bf16.mxu0 %v894_v33 }
 0x110   : > { %v882_v63 = vadd.f32 %v881_v62, %v445_v15  ;;  %v4341_v1 = vpop.f32.mrb[21].mxu1 }
 0x111   : > { %v884_v60 = vpop.f32.mrb[22].mxu1 }
 0x112   : > { %v885_v2 = vadd.f32 %v884_v60, %v446_v61  ;;  %v4342_v4 = vpop.f32.mrb[23].mxu1 }
 0x114   : > { %v895_v8 = vpack.c.bf16 %v885_v2, %v882_v63 }
 0x116   : > { %4372 = vmatmul.mubr.bf16.gmra.mrb[20].mxu0 %v895_v8 }
 0x117   : > { %4419 = vmatprep.mubr.msk.bf16.mxu0 %vm4906_vm0, %v4905_v0 }
 0x1c9   : > { %v4361_v30 = vpop.f32.mrb[8].mxu0 }
 0x1ca   : > { %v992_v16 = vadd.f32 %v4361_v30, %v5129_v14  ;;  %v983_v18 = vpop.f32.mrb[9].mxu0 }
 0x1cb   : > { %v984_v7 = vadd.f32 %v983_v18, %v5129_v14  ;;  %v4362_v22 = vpop.f32.mrb[10].mxu0  ;;  %v4762_v18 = vld [vmem:[%s5814_s3 + $0x6c] sm:$0xff]  }
 0x1cc   : > { %v995_v23 = vadd.f32 %v4362_v22, %v5129_v14  ;;  %v986_v24 = vpop.f32.mrb[11].mxu0  ;;  %v1048_v29 = vmax.f32 %v992_v16, 0.0  ;;  %v4764_v22 = vld [vmem:[%s5814_s3 + $0x7c] sm:$0xff]  }
 0x1cd   : > { %v987_v25 = vadd.f32 %v986_v24, %v5129_v14  ;;  %v1046_v32 = vmax.f32 %v984_v7, 0.0  ;;  %v4763_v7 = vld [vmem:[%s5814_s3 + $0x74] sm:$0xff]  }
 0x1ce   : > { %v1049_v31 = vmax.f32 %v995_v23, 0.0  ;;  %v1088_v23 = vsub.s32 1, %v5077_v26 }
 0x1cf   : > { %v1047_v33 = vmax.f32 %v987_v25, 0.0 }
 0x1d0   : > { %v5135_v34 = vpack.c.bf16 %v1049_v31, %v1048_v29  ;;  %v5278_v25 = vrot.slane %v5085_v28, %v1088_v23 }
 0x1d1   : > { %v5137_v5 = vpack.c.bf16 %v1047_v33, %v1046_v32 }
 0x1d2   : > { %v1072_v26 = vunpack.c.l.bf16 %v5135_v34 }
 0x1d3   : > { %4376 = vmatpush3.bf16.msra.mxu1 %v5137_v5  ;;  %v1070_v24 = vunpack.c.l.bf16 %v5137_v5  ;;  %v1071_v29 = vunpack.c.h.bf16 %v5137_v5 }
 0x1d4   : > { %4381 = vmatprep.subr.bf16.mxu1 %v4905_v0 }
 0x1d5   : > { %v1090_v32 = vmul.f32 %v5278_v25, %v1070_v24 }
 0x1d6   : > { %4378 = vmatmul.mubr.msk.bf16.vlgmr.msra.gmra.mrb[24].mxu1 %vm458_vm1, %v4966_v3 }
 0x1d7   : > { %4382 = vmatpush3.bf16.msra.mxu1 %v5135_v34  ;;  %4383 = vmatprep.mubr.msk.bf16.mxu1 %vm4906_vm0, %v4905_v0 }
 0x1d8   : > { %4387 = vmatprep.subr.bf16.mxu1 %v4905_v0 }
 0x1d9   : > { %v4365_v35 = vpop.f32.mrb[12].mxu0 }
 0x1da   : > { %v1008_v36 = vadd.f32 %v4365_v35, %v5129_v14  ;;  %v999_v37 = vpop.f32.mrb[13].mxu0  ;;  %v1091_v35 = vmul.f32 %v5278_v25, %v1071_v29 }
 0x1db   : > { %v1000_v38 = vadd.f32 %v999_v37, %v5129_v14  ;;  %v4366_v39 = vpop.f32.mrb[14].mxu0 }
 0x1dc   : > { %v1011_v40 = vadd.f32 %v4366_v39, %v5129_v14  ;;  %v1002_v41 = vpop.f32.mrb[15].mxu0  ;;  %v1052_v3 = vmax.f32 %v1008_v36, 0.0 }
 0x1dd   : > { %v1003_v42 = vadd.f32 %v1002_v41, %v5129_v14  ;;  %v1050_v44 = vmax.f32 %v1000_v38, 0.0  ;;  %v1073_v41 = vunpack.c.h.bf16 %v5135_v34 }
 0x1de   : > { %v1053_v43 = vmax.f32 %v1011_v40, 0.0  ;;  %4384 = vmatmul.mubr.msk.bf16.vlgmr.msra.gmra.mrb[28].mxu1 %vm458_vm1, %v4994_v9 }
 0x1df   : > { %v1051_v45 = vmax.f32 %v1003_v42, 0.0  ;;  %4389 = vmatprep.mubr.msk.bf16.mxu1 %vm4906_vm0, %v4905_v0  ;;  %v1092_v42 = vmul.f32 %v5278_v25, %v1072_v26 }
 0x1e0   : > { %v5155_v46 = vpack.c.bf16 %v1053_v43, %v1052_v3  ;;  %v1093_v3 = vmul.f32 %v5278_v25, %v1073_v41 }
 0x1e1   : > { %v5157_v47 = vpack.c.bf16 %v1051_v45, %v1050_v44  ;;  %v4369_v48 = vpop.f32.mrb[16].mxu0 }
 0x1e2   : > { %v1024_v49 = vadd.f32 %v4369_v48, %v5129_v14  ;;  %v1015_v50 = vpop.f32.mrb[17].mxu0 }
 0x1e3   : > { %v1016_v11 = vadd.f32 %v1015_v50, %v5129_v14  ;;  %v4370_v51 = vpop.f32.mrb[18].mxu0  ;;  %4388 = vmatpush3.bf16.msra.mxu1 %v5157_v47  ;;  %v1074_v50 = vunpack.c.l.bf16 %v5157_v47 }
 0x1e4   : > { %v1056_v52 = vmax.f32 %v1024_v49, 0.0  ;;  %v1027_v9 = vadd.f32 %v4370_v51, %v5129_v14  ;;  %v1018_v53 = vpop.f32.mrb[19].mxu0  ;;  %4393 = vmatprep.subr.bf16.mxu1 %v4905_v0 }
 0x1e5   : > { %v1054_v54 = vmax.f32 %v1016_v11, 0.0  ;;  %v1019_v55 = vadd.f32 %v1018_v53, %v5129_v14  ;;  %v1075_v11 = vunpack.c.h.bf16 %v5157_v47 }
 0x1e6   : > { %v1057_v56 = vmax.f32 %v1027_v9, 0.0  ;;  %4390 = vmatmul.mubr.msk.bf16.vlgmr.msra.gmra.mrb[32].mxu1 %vm458_vm1, %v5016_v13 }
 0x1e7   : > { %v1055_v57 = vmax.f32 %v1019_v55, 0.0  ;;  %4394 = vmatpush3.bf16.msra.mxu1 %v5155_v46  ;;  %4395 = vmatprep.mubr.msk.bf16.mxu1 %vm4906_vm0, %v4905_v0  ;;  %v1095_v53 = vmul.f32 %v5278_v25, %v1075_v11 }
 0x1e8   : > { %v5170_v58 = vpack.c.bf16 %v1057_v56, %v1056_v52  ;;  %4399 = vmatprep.subr.bf16.mxu1 %v4905_v0  ;;  %v1094_v52 = vmul.f32 %v5278_v25, %v1074_v50 }
 0x1e9   : > { %v5173_v59 = vpack.c.bf16 %v1055_v57, %v1054_v54  ;;  %v4373_v15 = vpop.f32.mrb[20].mxu0 }
 0x1ea   : > { %v1040_v61 = vadd.f32 %v4373_v15, %v5129_v14  ;;  %v1031_v62 = vpop.f32.mrb[21].mxu0 }
 0x1eb   : > { %v1032_v63 = vadd.f32 %v1031_v62, %v5129_v14  ;;  %v4374_v1 = vpop.f32.mrb[22].mxu0  ;;  %v1077_v62 = vunpack.c.h.bf16 %v5155_v46 }
 0x1ec   : > { %v1060_v13 = vmax.f32 %v1040_v61, 0.0  ;;  %v1043_v60 = vadd.f32 %v4374_v1, %v5129_v14  ;;  %v1034_v2 = vpop.f32.mrb[23].mxu0  ;;  %v1076_v61 = vunpack.c.l.bf16 %v5155_v46 }
 0x1ed   : > { %v1058_v4 = vmax.f32 %v1032_v63, 0.0  ;;  %v1035_v8 = vadd.f32 %v1034_v2, %v5129_v14  ;;  %v4761_v14 = vld [vmem:[%s5814_s3 + $0x64] sm:$0xff]  }
 0x1ee   : > { %v1061_v19 = vmax.f32 %v1043_v60, 0.0  ;;  %4396 = vmatmul.mubr.msk.bf16.vlgmr.msra.gmra.mrb[36].mxu1 %vm458_vm1, %v5036_v17  ;;  %v4757_v17 = vld [vmem:[%s5814_s3 + $0x44] sm:$0xff]   ;;  %v1096_v1 = vmul.f32 %v5278_v25, %v1076_v61  ;;  %v1097_v60 = vmul.f32 %v5278_v25, %v1077_v62 }
 0x1ef   : > { %v1059_v12 = vmax.f32 %v1035_v8, 0.0  ;;  %4400 = vmatpush3.bf16.msra.mxu1 %v5173_v59  ;;  %4401 = vmatprep.mubr.msk.bf16.mxu1 %vm4906_vm0, %v4905_v0 }
 0x1f0   : > { %v5184_v30 = vpack.c.bf16 %v1061_v19, %v1060_v13  ;;  %4405 = vmatprep.subr.bf16.mxu1 %v4905_v0 }
 0x1f1   : > { %v5187_v16 = vpack.c.bf16 %v1059_v12, %v1058_v4 }
 0x1f2   : > { %4418 = vmatpush3.bf16.msra.mxu0 %v5184_v30  ;;  %v1084_v12 = vunpack.c.l.bf16 %v5184_v30 }
 0x1f3   : > { %4455 = vmatprep.subr.bf16.mxu0 %v4905_v0 }
 0x1f5   : > { %4420 = vmatmul.mubr.msk.bf16.vlgmr.msra.gmra.mrb[24].mxu0 %vm458_vm1, %v5060_v21  ;;  %v4759_v21 = vld [vmem:[%s5814_s3 + $0x54] sm:$0xff]  }
 0x1f6   : > { %4402 = vmatmul.mubr.msk.bf16.vlgmr.msra.gmra.mrb[40].mxu1 %vm458_vm1, %v4982_v6  ;;  %4457 = vmatprep.mubr.msk.bf16.mxu0 %vm4906_vm0, %v4905_v0  ;;  %v5212_v6 = vld [vmem:[%s5814_s3 + $0x88] sm:$0xf] }
 0x1f7   : > { %4406 = vmatpush3.bf16.msra.mxu1 %v5170_v58  ;;  %4407 = vmatprep.mubr.msk.bf16.mxu1 %vm4906_vm0, %v4905_v0 }
 0x1f8   : > { %4411 = vmatprep.subr.bf16.mxu1 %v4905_v0 }
 0x1fb   : > { %4456 = vmatpush3.bf16.xpose.msra.mxu0 %v5137_v5 }
 0x1fc   : > { %4461 = vmatprep.subr.bf16.mxu0 %v4905_v0 }
 0x1fe   : > { %4408 = vmatmul.mubr.msk.bf16.vlgmr.msra.gmra.mrb[44].mxu1 %vm458_vm1, %v5051_v20  ;;  %v4758_v20 = vld [vmem:[%s5814_s3 + $0x4c] sm:$0xff]  }
 0x1ff   : > { %4412 = vmatpush3.bf16.msra.mxu1 %v5187_v16  ;;  %4413 = vmatprep.mubr.msk.bf16.mxu1 %vm4906_vm0, %v4905_v0 }
 0x200   : > { %4423 = vmatprep.subr.bf16.mxu1 %v4757_v17 }
 0x202   : > { %4458 = vmatmul.mubr.bf16.vlgmr.msra.gmra.mrb[28].mxu0 %v5212_v6 }
 0x203   : > { %4462 = vmatpush3.bf16.xpose.msra.mxu0 %v5135_v34  ;;  %4463 = vmatprep.mubr.msk.bf16.mxu0 %vm4906_vm0, %v4905_v0 }
 0x204   : > { %4467 = vmatprep.subr.bf16.mxu0 %v4905_v0 }
 0x206   : > { %4414 = vmatmul.mubr.msk.bf16.vlgmr.msra.gmra.mrb[48].mxu1 %vm458_vm1, %v5002_v10  ;;  %v4760_v10 = vld [vmem:[%s5814_s3 + $0x5c] sm:$0xff]  }
 0x207   : > { %4424 = vmatpush3.bf16.msra.mxu1 %v4757_v17  ;;  %v1085_v17 = vunpack.c.h.bf16 %v5184_v30 }
 0x208   : > { %4425 = vmatprep.subr.bf16.mxu1 %v4758_v20 }
 0x209   : > { %v1105_v23 = vmul.f32 %v5278_v25, %v1085_v17 }
 0x20a   : > { %4464 = vmatmul.mubr.bf16.vlgmr.msra.gmra.mrb[32].mxu0 %v5212_v6 }
 0x20b   : > { %4468 = vmatpush3.bf16.xpose.msra.mxu0 %v5157_v47  ;;  %4469 = vmatprep.mubr.msk.bf16.mxu0 %vm4906_vm0, %v4905_v0 }
 0x20c   : > { %4473 = vmatprep.subr.bf16.mxu0 %v4905_v0  ;;  %4426 = vmatpush3.bf16.msra.mxu1 %v4758_v20 }
 0x20d   : > { %4427 = vmatprep.subr.bf16.mxu1 %v4759_v21 }
 0x210   : > { %4428 = vmatpush3.bf16.msra.mxu1 %v4759_v21  ;;  %v1078_v21 = vunpack.c.l.bf16 %v5173_v59 }
 0x211   : > { %4429 = vmatprep.subr.bf16.mxu1 %v4760_v10 }
 0x212   : > { %4470 = vmatmul.mubr.bf16.vlgmr.msra.gmra.mrb[36].mxu0 %v5212_v6  ;;  %v1098_v24 = vmul.f32 %v5278_v25, %v1078_v21 }
 0x213   : > { %4474 = vmatpush3.bf16.xpose.msra.mxu0 %v5155_v46  ;;  %4475 = vmatprep.mubr.msk.bf16.mxu0 %vm4906_vm0, %v4905_v0 }
 0x214   : > { %4479 = vmatprep.subr.bf16.mxu0 %v4905_v0  ;;  %4430 = vmatpush3.bf16.msra.mxu1 %v4760_v10  ;;  %v1079_v10 = vunpack.c.h.bf16 %v5173_v59 }
 0x215   : > { %4431 = vmatprep.subr.bf16.mxu1 %v4761_v14 }
 0x218   : > { %4432 = vmatpush3.bf16.msra.mxu1 %v4761_v14 }
 0x219   : > { %4433 = vmatprep.subr.bf16.mxu1 %v4762_v18 }
 0x21a   : > { %4476 = vmatmul.mubr.bf16.vlgmr.msra.gmra.mrb[40].mxu0 %v5212_v6 }
 0x21b   : > { %4480 = vmatpush3.bf16.xpose.msra.mxu0 %v5173_v59  ;;  %4481 = vmatprep.mubr.msk.bf16.mxu0 %vm4906_vm0, %v4905_v0 }
 0x21c   : > { %4485 = vmatprep.subr.bf16.mxu0 %v4905_v0  ;;  %4434 = vmatpush3.bf16.msra.mxu1 %v4762_v18  ;;  %v1104_v18 = vmul.f32 %v5278_v25, %v1084_v12 }
 0x21d   : > { %4435 = vmatprep.subr.bf16.mxu1 %v4763_v7 }
 0x220   : > { %4436 = vmatpush3.bf16.msra.mxu1 %v4763_v7 }
 0x221   : > { %4437 = vmatprep.subr.bf16.mxu1 %v4764_v22 }
 0x222   : > { %4482 = vmatmul.mubr.bf16.vlgmr.msra.gmra.mrb[44].mxu0 %v5212_v6 }
 0x223   : > { %4486 = vmatpush3.bf16.xpose.msra.mxu0 %v5170_v58  ;;  %4487 = vmatprep.mubr.msk.bf16.mxu0 %vm4906_vm0, %v4905_v0 }
 0x224   : > { %4491 = vmatprep.subr.bf16.mxu0 %v4905_v0  ;;  %4438 = vmatpush3.bf16.msra.mxu1 %v4764_v22 }
 0x225   : > { %4497 = vmatprep.subr.bf16.mxu1 %v4905_v0 }
 0x22a   : > { %4488 = vmatmul.mubr.bf16.vlgmr.msra.gmra.mrb[48].mxu0 %v5212_v6 }
 0x22b   : > { %4492 = vmatpush3.bf16.xpose.msra.mxu0 %v5187_v16  ;;  %4493 = vmatprep.mubr.msk.bf16.mxu0 %vm4906_vm0, %v4905_v0 }
 0x22c   : > { %4503 = vmatprep.subr.bf16.mxu0 %v4905_v0 }
 0x232   : > { %4494 = vmatmul.mubr.bf16.vlgmr.msra.gmra.mrb[52].mxu0 %v5212_v6 }
 0x233   : > { %4504 = vmatpush3.bf16.msra.mxu0 %v5137_v5  ;;  %4505 = vmatprep.mubr.msk.bf16.mxu0 %vm4906_vm0, %v4905_v0 }
 0x234   : > { %4515 = vmatprep.subr.bf16.mxu0 %v4905_v0 }
 0x2a9   : > { %v1140_v31 = vpop.f32.mrb[24].mxu1 }
 0x2aa   : > { %v4379_v33 = vpop.f32.mrb[25].mxu1  ;;  %v1141_v37 = vadd.f32 %v1140_v31, %v1090_v32  ;;  %v1099_v32 = vmul.f32 %v5278_v25, %v1079_v10 }
 0x2ab   : > { %v1143_v36 = vpop.f32.mrb[26].mxu1 }
 0x2ac   : > { %v1144_v38 = vadd.f32 %v1143_v36, %v1091_v35  ;;  %v4380_v39 = vpop.f32.mrb[27].mxu1 }
 0x2ae   : > { %v1434_v40 = vpack.c.bf16 %v1144_v38, %v1141_v37 }
 0x2b0   : > { %4439 = vmatprep.mubr.bf16.mxu1 %v1434_v40 }
 0x2b1   : > { %v1181_v28 = vpop.f32.mrb[28].mxu1 }
 0x2b2   : > { %v4385_v5 = vpop.f32.mrb[29].mxu1  ;;  %v1182_v44 = vadd.f32 %v1181_v28, %v1092_v42  ;;  %v1080_v28 = vunpack.c.l.bf16 %v5170_v58  ;;  %v1081_v42 = vunpack.c.h.bf16 %v5170_v58 }
 0x2b3   : > { %v1184_v43 = vpop.f32.mrb[30].mxu1 }
 0x2b4   : > { %v1185_v45 = vadd.f32 %v1184_v43, %v1093_v3  ;;  %v4386_v48 = vpop.f32.mrb[31].mxu1  ;;  %v1100_v3 = vmul.f32 %v5278_v25, %v1080_v28 }
 0x2b6   : > { %v1435_v49 = vpack.c.bf16 %v1185_v45, %v1182_v44  ;;  %v1101_v44 = vmul.f32 %v5278_v25, %v1081_v42 }
 0x2b8   : > { %4440 = vmatmul.mubr.bf16.vlgmr.msra.gmra.mrb[52].mxu1 %v1435_v49 }
 0x2b9   : > { %4498 = vmatpush3.bf16.xpose.msra.mxu1 %v5184_v30  ;;  %v1222_v51 = vpop.f32.mrb[32].mxu1 }
 0x2ba   : > { %v4391_v9 = vpop.f32.mrb[33].mxu1  ;;  %4509 = vmatprep.subr.bf16.mxu1 %v4905_v0  ;;  %v1223_v55 = vadd.f32 %v1222_v51, %v1094_v52 }
 0x2bb   : > { %v1225_v54 = vpop.f32.mrb[34].mxu1  ;;  %v1082_v9 = vunpack.c.l.bf16 %v5187_v16 }
 0x2bc   : > { %v1226_v56 = vadd.f32 %v1225_v54, %v1095_v53  ;;  %v4392_v57 = vpop.f32.mrb[35].mxu1  ;;  %v1083_v53 = vunpack.c.h.bf16 %v5187_v16 }
 0x2be   : > { %v1436_v15 = vpack.c.bf16 %v1226_v56, %v1223_v55  ;;  %v1103_v62 = vmul.f32 %v5278_v25, %v1083_v53 }
 0x2c0   : > { %4443 = vmatprep.mubr.bf16.mxu1 %v1436_v15  ;;  %v1102_v15 = vmul.f32 %v5278_v25, %v1082_v9 }
 0x2c1   : > { %v1263_v63 = vpop.f32.mrb[36].mxu1 }
 0x2c2   : > { %v4397_v13 = vpop.f32.mrb[37].mxu1  ;;  %v1264_v4 = vadd.f32 %v1263_v63, %v1096_v1 }
 0x2c3   : > { %v1266_v2 = vpop.f32.mrb[38].mxu1 }
 0x2c4   : > { %v1267_v8 = vadd.f32 %v1266_v2, %v1097_v60  ;;  %v4398_v19 = vpop.f32.mrb[39].mxu1 }
 0x2c6   : > { %v1437_v20 = vpack.c.bf16 %v1267_v8, %v1264_v4 }
 0x2c8   : > { %v1427_v14 = vpop.f32.mrb[24].mxu0  ;;  %4444 = vmatmul.mubr.bf16.gmra.mrb[56].mxu1 %v1437_v20 }
 0x2c9   : > { %v1304_v7 = vpop.f32.mrb[40].mxu1  ;;  %v4421_v22 = vpop.f32.mrb[25].mxu0  ;;  %v1428_v33 = vadd.f32 %v1427_v14, %v1104_v18 }
 0x2ca   : > { %v4403_v29 = vpop.f32.mrb[41].mxu1  ;;  %v1430_v31 = vpop.f32.mrb[26].mxu0  ;;  %v1305_v38 = vadd.f32 %v1304_v7, %v1098_v24 }
 0x2cb   : > { %v1431_v35 = vadd.f32 %v1430_v31, %v1105_v23  ;;  %v1307_v36 = vpop.f32.mrb[42].mxu1  ;;  %v4422_v37 = vpop.f32.mrb[27].mxu0 }
 0x2cc   : > { %v1308_v39 = vadd.f32 %v1307_v36, %v1099_v32  ;;  %v4404_v40 = vpop.f32.mrb[43].mxu1 }
 0x2cd   : > { %v1441_v26 = vpack.c.bf16 %v1431_v35, %v1428_v33 }
 0x2ce   : > { %v1438_v41 = vpack.c.bf16 %v1308_v39, %v1305_v38 }
 0x2d0   : > { %4447 = vmatprep.mubr.bf16.mxu1 %v1438_v41 }
 0x2d1   : > { %v1345_v5 = vpop.f32.mrb[44].mxu1 }
 0x2d2   : > { %v4409_v43 = vpop.f32.mrb[45].mxu1  ;;  %v1346_v48 = vadd.f32 %v1345_v5, %v1100_v3 }
 0x2d3   : > { %v1348_v45 = vpop.f32.mrb[46].mxu1 }
 0x2d4   : > { %v1349_v49 = vadd.f32 %v1348_v45, %v1101_v44  ;;  %v4410_v50 = vpop.f32.mrb[47].mxu1 }
 0x2d5   : > { %v5309_v11 = vpop.f32.mrb[28].mxu0 }
 0x2d6   : > { %v1439_v51 = vpack.c.bf16 %v1349_v49, %v1346_v48  ;;  %v1936_v52 = vsel %vm458_vm1, %v5309_v11, -inf  ;;  %v4459_v54 = vpop.f32.mrb[29].mxu0 }
 0x2d7   : > { %1937 = vmax.xlane.f32.xlu0 %v1936_v52  ;;  %v1653_v55 = vpop.f32.mrb[30].mxu0 }
 0x2d8   : > { %4448 = vmatmul.mubr.bf16.gmra.mrb[60].mxu1 %v1439_v51  ;;  %v4460_v56 = vpop.f32.mrb[31].mxu0  ;;  %v293_v51 = vld [vmem:[%s5814_s3 + $0x84] sm:$0x1] }
 0x2d9   : > { %v1386_v57 = vpop.f32.mrb[48].mxu1  ;;  %v1442_v53 = vunpack.c.l.bf16 %v293_v51 }
 0x2da   : > { %v4415_v61 = vpop.f32.mrb[49].mxu1  ;;  %v1387_v1 = vadd.f32 %v1386_v57, %v1102_v15 }
 0x2db   : > { %v1389_v63 = vpop.f32.mrb[50].mxu1  ;;  %v5352_v56 = vrot.slane %v1442_v53, %v5080_v27 }
 0x2dc   : > { %v1390_v13 = vadd.f32 %v1389_v63, %v1103_v62  ;;  %v4416_v60 = vpop.f32.mrb[51].mxu1 }
 0x2dd   : > { %v5317_v2 = vpop.f32.mrb[32].mxu0 }
 0x2de   : > { %v1440_v4 = vpack.c.bf16 %v1390_v13, %v1387_v1  ;;  %v4465_v8 = vpop.f32.mrb[33].mxu0  ;;  %v1939_v19 = vsel %vm458_vm1, %v5317_v2, -inf }
 0x2df   : > { %v1693_v12 = vpop.f32.mrb[34].mxu0  ;;  %1940 = vmax.xlane.f32.xlu0 %v1939_v19 }
 0x2e0   : > { %4451 = vmatprep.mubr.bf16.mxu1 %v1440_v4  ;;  %v4466_v17 = vpop.f32.mrb[35].mxu0 }
 0x2e1   : > { %4452 = vmatmul.mubr.bf16.gmra.mrb[64].mxu1 %v1441_v26 }
 0x2e2   : > { %4499 = vmatprep.mubr.msk.bf16.mxu1 %vm4906_vm0, %v4905_v0 }
 0x2e5   : > { %v1730_v25 = vpop.f32.mrb[36].mxu0 }
 0x2e6   : > { %v1942_v20 = vsel %vm458_vm1, %v1730_v25, -inf  ;;  %v4471_v21 = vpop.f32.mrb[37].mxu0 }
 0x2e7   : > { %1943 = vmax.xlane.f32.xlu1 %v1942_v20  ;;  %v1733_v10 = vpop.f32.mrb[38].mxu0 }
 0x2e8   : > { %v4472_v14 = vpop.f32.mrb[39].mxu0 }
 0x2e9   : > { %4500 = vmatmul.mubr.bf16.vlgmr.msra.gmra.mrb[68].mxu1 %v5212_v6 }
 0x2ea   : > { %4510 = vmatpush3.bf16.msra.mxu1 %v5135_v34  ;;  %4511 = vmatprep.mubr.msk.bf16.mxu1 %vm4906_vm0, %v4905_v0 }
 0x2eb   : > { %4521 = vmatprep.subr.bf16.mxu1 %v4905_v0 }
 0x2ed   : > { %v5329_v18 = vpop.f32.mrb[40].mxu0 }
 0x2ee   : > { %v4477_v7 = vpop.f32.mrb[41].mxu0  ;;  %v1945_v22 = vsel %vm458_vm1, %v5329_v18, -inf }
 0x2ef   : > { %v1773_v23 = vpop.f32.mrb[42].mxu0  ;;  %1946 = vmax.xlane.f32.xlu1 %v1945_v22 }
 0x2f0   : > { %v4478_v24 = vpop.f32.mrb[43].mxu0 }
 0x2f5   : > { %v1810_v29 = vpop.f32.mrb[44].mxu0 }
 0x2f6   : > { %v1948_v31 = vsel %vm458_vm1, %v1810_v29, -inf  ;;  %v4483_v6 = vpop.f32.mrb[45].mxu0 }
 0x2f7   : > { %1949 = vmax.xlane.f32.xlu0 %v1948_v31  ;;  %v1813_v34 = vpop.f32.mrb[46].mxu0 }
 0x2f8   : > { %v4484_v32 = vpop.f32.mrb[47].mxu0 }
 0x2fd   : > { %v5334_v33 = vpop.f32.mrb[48].mxu0 }
 0x2fe   : > { %v4489_v35 = vpop.f32.mrb[49].mxu0  ;;  %v1951_v36 = vsel %vm458_vm1, %v5334_v33, -inf }
 0x2ff   : > { %v1853_v37 = vpop.f32.mrb[50].mxu0  ;;  %1952 = vmax.xlane.f32.xlu1 %v1951_v36 }
 0x300   : > { %v4490_v38 = vpop.f32.mrb[51].mxu0 }
 0x305   : > { %v1890_v39 = vpop.f32.mrb[52].mxu0 }
 0x306   : > { %v1954_v40 = vsel %vm458_vm1, %v1890_v39, -inf  ;;  %v4495_v26 = vpop.f32.mrb[53].mxu0 }
 0x307   : > { %1955 = vmax.xlane.f32.xlu0 %v1954_v40  ;;  %v1893_v41 = vpop.f32.mrb[54].mxu0 }
 0x308   : > { %v4496_v28 = vpop.f32.mrb[55].mxu0 }
 0x364   : > { %v1938_v42 = vpop.xlane.xlu0 %1937 }
 0x365   : > { %v1960_v5 = vsub.f32 %v5309_v11, %v1938_v42 }
 0x367   : > { %v1968_v3 = vmul.f32 1.442695, %v1960_v5 }
 0x369   : > { %4829 = vpow2.f32 %v1968_v3 }
 0x36c   : > { %v1941_v50 = vpop.xlane.xlu0 %1940 }
 0x36d   : > { %v1961_v42 = vsub.f32 %v5317_v2, %v1941_v50 }
 0x373   : > { %v5340_v43 = vpop.eup %4829 }
 0x374   : > { %v1944_v44 = vpop.xlane.xlu1 %1943  ;;  %v1984_v45 = vsel %vm458_vm1, %v5340_v43, 0.0 }
 0x375   : > { %v1962_v48 = vsub.f32 %v1730_v25, %v1944_v44  ;;  %1985 = vadd.xlane.f32.xlu0 %v1984_v45 }
 0x377   : > { %v1972_v49 = vmul.f32 1.442695, %v1962_v48 }
 0x379   : > { %4831 = vpow2.f32 %v1972_v49 }
 0x37c   : > { %v1947_v48 = vpop.xlane.xlu1 %1946 }
 0x383   : > { %v5347_v52 = vpop.eup %4831 }
 0x384   : > { %v1950_v11 = vpop.xlane.xlu0 %1949  ;;  %v1990_v9 = vsel %vm458_vm1, %v5347_v52, 0.0 }
 0x385   : > { %v1964_v54 = vsub.f32 %v1810_v29, %v1950_v11  ;;  %1991 = vadd.xlane.f32.xlu0 %v1990_v9  ;;  %v1970_v9 = vmul.f32 1.442695, %v1961_v42 }
 0x387   : > { %v1976_v55 = vmul.f32 1.442695, %v1964_v54 }
 0x389   : > { %4833 = vpow2.f32 %v1976_v55  ;;  %v1963_v55 = vsub.f32 %v5329_v18, %v1947_v48 }
 0x38b   : > { %v4441_v57 = vpop.f32.mrb[52].mxu1 }
 0x38c   : > { %v1538_v15 = vadd.f32 %v4441_v57, %v5352_v56  ;;  %v1529_v61 = vpop.f32.mrb[53].mxu1  ;;  %v1953_v2 = vpop.xlane.xlu1 %1952 }
 0x38d   : > { %v1530_v62 = vadd.f32 %v1529_v61, %v5352_v56  ;;  %v4442_v63 = vpop.f32.mrb[54].mxu1 }
 0x38e   : > { %v1541_v1 = vadd.f32 %v4442_v63, %v5352_v56  ;;  %v1532_v13 = vpop.f32.mrb[55].mxu1  ;;  %v1594_v4 = vmax.f32 %v1538_v15, 0.0 }
 0x38f   : > { %v1533_v60 = vadd.f32 %v1532_v13, %v5352_v56  ;;  %v1592_v19 = vmax.f32 %v1530_v62, 0.0  ;;  %v1974_v62 = vmul.f32 1.442695, %v1963_v55 }
 0x390   : > { %v1595_v8 = vmax.f32 %v1541_v1, 0.0  ;;  %v1965_v1 = vsub.f32 %v5334_v33, %v1953_v2 }
 0x391   : > { %v1593_v12 = vmax.f32 %v1533_v60, 0.0 }
 0x392   : > { %v5358_v17 = vpack.c.bf16 %v1595_v8, %v1594_v4 }
 0x393   : > { %v5360_v25 = vpop.eup %4833  ;;  %v5362_v20 = vpack.c.bf16 %v1593_v12, %v1592_v19 }
 0x394   : > { %v1956_v21 = vpop.xlane.xlu0 %1955  ;;  %v1996_v10 = vsel %vm458_vm1, %v5360_v25, 0.0 }
 0x395   : > { %v1966_v14 = vsub.f32 %v1890_v39, %v1956_v21  ;;  %1997 = vadd.xlane.f32.xlu0 %v1996_v10  ;;  %v1978_v21 = vmul.f32 1.442695, %v1965_v1 }
 0x397   : > { %v1980_v7 = vmul.f32 1.442695, %v1966_v14 }
 0x399   : > { %4835 = vpow2.f32 %v1980_v7 }
 0x39a   : > { %4837 = vpow2.f32 %v1970_v9 }
 0x39b   : > { %v4445_v22 = vpop.f32.mrb[56].mxu1  ;;  %4839 = vpow2.f32 %v1974_v62 }
 0x39c   : > { %v1554_v23 = vadd.f32 %v4445_v22, %v5352_v56  ;;  %v1545_v24 = vpop.f32.mrb[57].mxu1  ;;  %4841 = vpow2.f32 %v1978_v21 }
 0x39d   : > { %v1546_v29 = vadd.f32 %v1545_v24, %v5352_v56  ;;  %v4446_v31 = vpop.f32.mrb[58].mxu1 }
 0x39e   : > { %v1557_v6 = vadd.f32 %v4446_v31, %v5352_v56  ;;  %v1548_v34 = vpop.f32.mrb[59].mxu1  ;;  %v1598_v35 = vmax.f32 %v1554_v23, 0.0 }
 0x39f   : > { %v1549_v32 = vadd.f32 %v1548_v34, %v5352_v56  ;;  %v1596_v37 = vmax.f32 %v1546_v29, 0.0 }
 0x3a0   : > { %v1599_v36 = vmax.f32 %v1557_v6, 0.0 }
 0x3a1   : > { %v1597_v38 = vmax.f32 %v1549_v32, 0.0 }
 0x3a2   : > { %v5370_v39 = vpack.c.bf16 %v1599_v36, %v1598_v35 }
 0x3a3   : > { %v5372_v40 = vpop.eup %4835  ;;  %v5374_v26 = vpack.c.bf16 %v1597_v38, %v1596_v37 }
 0x3a4   : > { %v2002_v41 = vsel %vm458_vm1, %v5372_v40, 0.0  ;;  %v5398_v6 = vpop.eup %4837 }
 0x3a5   : > { %2003 = vadd.xlane.f32.xlu0 %v2002_v41  ;;  %v5402_v35 = vpop.eup %4839 }
 0x3a6   : > { %v1993_v36 = vsel %vm458_vm1, %v5402_v35, 0.0  ;;  %v5406_v37 = vpop.eup %4841 }
 0x3a7   : > { %v1999_v38 = vsel %vm458_vm1, %v5406_v37, 0.0 }
 0x3ab   : > { %v4449_v28 = vpop.f32.mrb[60].mxu1 }
 0x3ac   : > { %v1570_v5 = vadd.f32 %v4449_v28, %v5352_v56  ;;  %v1561_v3 = vpop.f32.mrb[61].mxu1 }
 0x3ad   : > { %v1562_v44 = vadd.f32 %v1561_v3, %v5352_v56  ;;  %v4450_v45 = vpop.f32.mrb[62].mxu1 }
 0x3ae   : > { %v1573_v49 = vadd.f32 %v4450_v45, %v5352_v56  ;;  %v1564_v51 = vpop.f32.mrb[63].mxu1  ;;  %v1602_v53 = vmax.f32 %v1570_v5, 0.0 }
 0x3af   : > { %v1565_v11 = vadd.f32 %v1564_v51, %v5352_v56  ;;  %v1600_v57 = vmax.f32 %v1562_v44, 0.0 }
 0x3b0   : > { %v1603_v54 = vmax.f32 %v1573_v49, 0.0 }
 0x3b1   : > { %v1601_v15 = vmax.f32 %v1565_v11, 0.0 }
 0x3b2   : > { %v5384_v50 = vpack.c.bf16 %v1603_v54, %v1602_v53 }
 0x3b3   : > { %v5386_v61 = vpack.c.bf16 %v1601_v15, %v1600_v57 }
 0x3b4   : > { %v4453_v63 = vpop.f32.mrb[64].mxu1 }
 0x3b5   : > { %v1586_v13 = vadd.f32 %v4453_v63, %v5352_v56  ;;  %v1577_v60 = vpop.f32.mrb[65].mxu1 }
 0x3b6   : > { %v1578_v4 = vadd.f32 %v1577_v60, %v5352_v56  ;;  %v4454_v8 = vpop.f32.mrb[66].mxu1 }
 0x3b7   : > { %v1589_v18 = vadd.f32 %v4454_v8, %v5352_v56  ;;  %v1580_v19 = vpop.f32.mrb[67].mxu1  ;;  %v1606_v10 = vmax.f32 %v1586_v13, 0.0 }
 0x3b8   : > { %v1581_v12 = vadd.f32 %v1580_v19, %v5352_v56  ;;  %v1604_v7 = vmax.f32 %v1578_v4, 0.0  ;;  %v1987_v56 = vsel %vm458_vm1, %v5398_v6, 0.0 }
 0x3b9   : > { %v1607_v14 = vmax.f32 %v1589_v18, 0.0 }
 0x3ba   : > { %v1605_v22 = vmax.f32 %v1581_v12, 0.0 }
 0x3bb   : > { %v5393_v23 = vpack.c.bf16 %v1607_v14, %v1606_v10 }
 0x3bc   : > { %v5395_v33 = vpack.c.bf16 %v1605_v22, %v1604_v7  ;;  %v1930_v24 = vpop.f32.mrb[68].mxu1 }
 0x3bd   : > { %v1957_v29 = vsel %vm458_vm1, %v1930_v24, -inf  ;;  %v4501_v31 = vpop.f32.mrb[69].mxu1 }
 0x3be   : > { %1958 = vmax.xlane.f32.xlu1 %v1957_v29  ;;  %v1933_v34 = vpop.f32.mrb[70].mxu1 }
 0x3bf   : > { %v4502_v32 = vpop.f32.mrb[71].mxu1 }
 0x3c2   : > { %1988 = vadd.xlane.f32.xlu1 %v1987_v56 }
 0x3c6   : > { %1994 = vadd.xlane.f32.xlu1 %v1993_v36 }
 0x3ca   : > { %2000 = vadd.xlane.f32.xlu1 %v1999_v38 }
 0x402   : > { %v1986_v41 = vpop.xlane.xlu0 %1985 }
 0x403   : > { %4843 = vrcp.f32 %v1986_v41 }
 0x40d   : > { %v4844_v28 = vpop.eup %4843 }
 0x40e   : > { %v2016_v42 = vmul.f32 %v4844_v28, %v5340_v43 }
 0x410   : > { %v2024_v5 = vpack.c.bf16 %v2016_v42, %v2016_v42 }
 0x412   : > { %4506 = vmatmul.mubr.msk.bf16.vlgmr.msra.gmra.mrb[56].mxu0 %vm458_vm1, %v2024_v5  ;;  %v1992_v3 = vpop.xlane.xlu0 %1991 }
 0x413   : > { %4516 = vmatpush3.bf16.msra.mxu0 %v5157_v47  ;;  %4845 = vrcp.f32 %v1992_v3  ;;  %4517 = vmatprep.mubr.msk.bf16.mxu0 %vm4906_vm0, %v4905_v0 }
 0x414   : > { %4527 = vmatprep.subr.bf16.mxu0 %v4905_v0 }
 0x41d   : > { %v4846_v44 = vpop.eup %4845 }
 0x41e   : > { %v2018_v45 = vmul.f32 %v4846_v44, %v5347_v52 }
 0x420   : > { %v2026_v48 = vpack.c.bf16 %v2018_v45, %v2018_v45 }
 0x422   : > { %4518 = vmatmul.mubr.msk.bf16.vlgmr.msra.gmra.mrb[60].mxu0 %vm458_vm1, %v2026_v48  ;;  %v1998_v49 = vpop.xlane.xlu0 %1997 }
 0x423   : > { %4528 = vmatpush3.bf16.msra.mxu0 %v5173_v59  ;;  %4847 = vrcp.f32 %v1998_v49  ;;  %4529 = vmatprep.mubr.msk.bf16.mxu0 %vm4906_vm0, %v4905_v0 }
 0x424   : > { %4539 = vmatprep.subr.bf16.mxu0 %v4905_v0 }
 0x42d   : > { %v4848_v47 = vpop.eup %4847 }
 0x42e   : > { %v2020_v43 = vmul.f32 %v4848_v47, %v5360_v25 }
 0x430   : > { %v2028_v51 = vpack.c.bf16 %v2020_v43, %v2020_v43 }
 0x432   : > { %4530 = vmatmul.mubr.msk.bf16.vlgmr.msra.gmra.mrb[64].mxu0 %vm458_vm1, %v2028_v51  ;;  %v2004_v11 = vpop.xlane.xlu0 %2003 }
 0x433   : > { %4540 = vmatpush3.bf16.msra.mxu0 %v5187_v16  ;;  %4849 = vrcp.f32 %v2004_v11  ;;  %4541 = vmatprep.mubr.msk.bf16.mxu0 %vm4906_vm0, %v4905_v0  ;;  %v5437_v16 = vld [vmem:[%s5814_s3 + $0x8c] sm:$0xf] }
 0x434   : > { %4551 = vmatprep.subr.bf16.mxu0 %v4905_v0 }
 0x43d   : > { %v4850_v59 = vpop.eup %4849 }
 0x43e   : > { %v2022_v52 = vmul.f32 %v4850_v59, %v5372_v40 }
 0x440   : > { %v2030_v9 = vpack.c.bf16 %v2022_v52, %v2022_v52 }
 0x442   : > { %4542 = vmatmul.mubr.msk.bf16.vlgmr.msra.gmra.mrb[68].mxu0 %vm458_vm1, %v2030_v9 }
 0x443   : > { %4552 = vmatpush3.bf16.xpose.msra.mxu0 %v5362_v20  ;;  %4553 = vmatprep.mubr.msk.bf16.mxu0 %vm4906_vm0, %v4905_v0 }
 0x444   : > { %4563 = vmatprep.subr.bf16.mxu0 %v4905_v0 }
 0x44a   : > { %4554 = vmatmul.mubr.bf16.vlgmr.msra.gmra.mrb[72].mxu0 %v5437_v16 }
 0x44b   : > { %4564 = vmatpush3.bf16.xpose.msra.mxu0 %v5374_v26  ;;  %v1959_v25 = vpop.xlane.xlu1 %1958  ;;  %4565 = vmatprep.mubr.msk.bf16.mxu0 %vm4906_vm0, %v4905_v0 }
 0x44c   : > { %v1967_v40 = vsub.f32 %v1930_v24, %v1959_v25  ;;  %4575 = vmatprep.subr.bf16.mxu0 %v4905_v0 }
 0x44e   : > { %v1982_v53 = vmul.f32 1.442695, %v1967_v40 }
 0x44f   : > { %v1989_v54 = vpop.xlane.xlu1 %1988 }
 0x450   : > { %4851 = vpow2.f32 %v1982_v53 }
 0x451   : > { %4853 = vrcp.f32 %v1989_v54 }
 0x452   : > { %4566 = vmatmul.mubr.bf16.vlgmr.msra.gmra.mrb[76].mxu0 %v5437_v16 }
 0x453   : > { %4576 = vmatpush3.bf16.xpose.msra.mxu0 %v5386_v61  ;;  %v1995_v55 = vpop.xlane.xlu1 %1994  ;;  %4577 = vmatprep.mubr.msk.bf16.mxu0 %vm4906_vm0, %v4905_v0 }
 0x454   : > { %4587 = vmatprep.subr.bf16.mxu0 %v4905_v0  ;;  %4855 = vrcp.f32 %v1995_v55 }
 0x457   : > { %v2001_v15 = vpop.xlane.xlu1 %2000 }
 0x458   : > { %4857 = vrcp.f32 %v2001_v15 }
 0x45a   : > { %v4852_v57 = vpop.eup %4851  ;;  %4578 = vmatmul.mubr.bf16.vlgmr.msra.gmra.mrb[80].mxu0 %v5437_v16 }
 0x45b   : > { %v4854_v2 = vpop.eup %4853  ;;  %4588 = vmatpush3.bf16.xpose.msra.mxu0 %v5395_v33  ;;  %v2005_v62 = vsel %vm458_vm1, %v4852_v57, 0.0  ;;  %4589 = vmatprep.mubr.msk.bf16.mxu0 %vm4906_vm0, %v4905_v0 }
 0x45c   : > { %v2017_v63 = vmul.f32 %v4854_v2, %v5398_v6  ;;  %2006 = vadd.xlane.f32.xlu1 %v2005_v62  ;;  %4599 = vmatprep.subr.bf16.mxu0 %v4905_v0 }
 0x45e   : > { %v2025_v1 = vpack.c.bf16 %v2017_v63, %v2017_v63  ;;  %v4856_v13 = vpop.eup %4855 }
 0x45f   : > { %v2019_v60 = vmul.f32 %v4856_v13, %v5402_v35 }
 0x460   : > { %4512 = vmatmul.mubr.msk.bf16.vlgmr.msra.gmra.mrb[72].mxu1 %vm458_vm1, %v2025_v1 }
 0x461   : > { %4522 = vmatpush3.bf16.msra.mxu1 %v5155_v46  ;;  %4523 = vmatprep.mubr.msk.bf16.mxu1 %vm4906_vm0, %v4905_v0  ;;  %v2027_v4 = vpack.c.bf16 %v2019_v60, %v2019_v60 }
 0x462   : > { %4590 = vmatmul.mubr.bf16.vlgmr.msra.gmra.mrb[84].mxu0 %v5437_v16  ;;  %4533 = vmatprep.subr.bf16.mxu1 %v4905_v0  ;;  %v4858_v8 = vpop.eup %4857 }
 0x463   : > { %4600 = vmatpush3.bf16.msra.mxu0 %v5362_v20  ;;  %4601 = vmatprep.mubr.msk.bf16.mxu0 %vm4906_vm0, %v4905_v0  ;;  %v2021_v46 = vmul.f32 %v4858_v8, %v5406_v37 }
 0x464   : > { %4611 = vmatprep.subr.bf16.mxu0 %v4905_v0 }
 0x465   : > { %v2029_v18 = vpack.c.bf16 %v2021_v46, %v2021_v46 }
 0x468   : > { %4524 = vmatmul.mubr.msk.bf16.vlgmr.msra.gmra.mrb[76].mxu1 %vm458_vm1, %v2027_v4 }
 0x469   : > { %4534 = vmatpush3.bf16.msra.mxu1 %v5170_v58  ;;  %4535 = vmatprep.mubr.msk.bf16.mxu1 %vm4906_vm0, %v4905_v0 }
 0x46a   : > { %4545 = vmatprep.subr.bf16.mxu1 %v4905_v0 }
 0x470   : > { %4536 = vmatmul.mubr.msk.bf16.vlgmr.msra.gmra.mrb[80].mxu1 %vm458_vm1, %v2029_v18 }
 0x471   : > { %4546 = vmatpush3.bf16.msra.mxu1 %v5184_v30  ;;  %4547 = vmatprep.mubr.msk.bf16.mxu1 %vm4906_vm0, %v4905_v0 }
 0x472   : > { %4557 = vmatprep.subr.bf16.mxu1 %v4905_v0 }
 0x4e5   : > { %v5478_v20 = vpop.f32.mrb[56].mxu0 }
 0x4e6   : > { %v4507_v58 = vpop.f32.mrb[57].mxu0 }
 0x4e7   : > { %v2072_v19 = vpop.f32.mrb[58].mxu0 }
 0x4e8   : > { %v4508_v12 = vpop.f32.mrb[59].mxu0 }
 0x4e9   : > { %v2007_v21 = vpop.xlane.xlu1 %2006 }
 0x4ea   : > { %4859 = vrcp.f32 %v2007_v21 }
 0x4f4   : > { %v4860_v10 = vpop.eup %4859 }
 0x4f5   : > { %v2023_v14 = vmul.f32 %v4860_v10, %v4852_v57  ;;  %v5480_v7 = vpop.f32.mrb[60].mxu0 }
 0x4f6   : > { %v4519_v22 = vpop.f32.mrb[61].mxu0 }
 0x4f7   : > { %v2158_v24 = vpop.f32.mrb[62].mxu0  ;;  %v2031_v29 = vpack.c.bf16 %v2023_v14, %v2023_v14 }
 0x4f8   : > { %v4520_v30 = vpop.f32.mrb[63].mxu0 }
 0x4f9   : > { %4548 = vmatmul.mubr.msk.bf16.vlgmr.msra.gmra.mrb[84].mxu1 %vm458_vm1, %v2031_v29 }
 0x4fa   : > { %4558 = vmatpush3.bf16.xpose.msra.mxu1 %v5358_v17  ;;  %4559 = vmatprep.mubr.msk.bf16.mxu1 %vm4906_vm0, %v4905_v0 }
 0x4fb   : > { %4569 = vmatprep.subr.bf16.mxu1 %v4905_v0 }
 0x501   : > { %4560 = vmatmul.mubr.bf16.vlgmr.msra.gmra.mrb[88].mxu1 %v5437_v16 }
 0x502   : > { %4570 = vmatpush3.bf16.xpose.msra.mxu1 %v5370_v39  ;;  %4571 = vmatprep.mubr.msk.bf16.mxu1 %vm4906_vm0, %v4905_v0 }
 0x503   : > { %4581 = vmatprep.subr.bf16.mxu1 %v4905_v0 }
 0x505   : > { %v5492_v31 = vpop.f32.mrb[64].mxu0 }
 0x506   : > { %v4531_v6 = vpop.f32.mrb[65].mxu0 }
 0x507   : > { %v2244_v34 = vpop.f32.mrb[66].mxu0 }
 0x508   : > { %v4532_v32 = vpop.f32.mrb[67].mxu0 }
 0x509   : > { %4572 = vmatmul.mubr.bf16.vlgmr.msra.gmra.mrb[92].mxu1 %v5437_v16 }
 0x50a   : > { %4582 = vmatpush3.bf16.xpose.msra.mxu1 %v5384_v50  ;;  %4583 = vmatprep.mubr.msk.bf16.mxu1 %vm4906_vm0, %v4905_v0 }
 0x50b   : > { %4593 = vmatprep.subr.bf16.mxu1 %v4905_v0 }
 0x511   : > { %4584 = vmatmul.mubr.bf16.vlgmr.msra.gmra.mrb[96].mxu1 %v5437_v16 }
 0x512   : > { %4594 = vmatpush3.bf16.xpose.msra.mxu1 %v5393_v23  ;;  %4595 = vmatprep.mubr.msk.bf16.mxu1 %vm4906_vm0, %v4905_v0 }
 0x513   : > { %4605 = vmatprep.subr.bf16.mxu1 %v4905_v0 }
 0x515   : > { %v5504_v56 = vpop.f32.mrb[68].mxu0 }
 0x516   : > { %v4543_v35 = vpop.f32.mrb[69].mxu0 }
 0x517   : > { %v2330_v36 = vpop.f32.mrb[70].mxu0 }
 0x518   : > { %v4544_v37 = vpop.f32.mrb[71].mxu0 }
 0x519   : > { %4596 = vmatmul.mubr.bf16.vlgmr.msra.gmra.mrb[100].mxu1 %v5437_v16 }
 0x51a   : > { %4606 = vmatpush3.bf16.msra.mxu1 %v5358_v17  ;;  %4607 = vmatprep.mubr.msk.bf16.mxu1 %vm4906_vm0, %v4905_v0 }
 0x51b   : > { %4617 = vmatprep.subr.bf16.mxu1 %v4905_v0 }
 0x51d   : > { %v2414_v38 = vpop.f32.mrb[72].mxu0 }
 0x51e   : > { %v2700_v41 = vsel %vm458_vm1, %v2414_v38, -inf  ;;  %v4555_v28 = vpop.f32.mrb[73].mxu0 }
 0x51f   : > { %2701 = vmax.xlane.f32.xlu0 %v2700_v41  ;;  %v2417_v42 = vpop.f32.mrb[74].mxu0 }
 0x520   : > { %v4556_v5 = vpop.f32.mrb[75].mxu0 }
 0x525   : > { %v2494_v3 = vpop.f32.mrb[76].mxu0 }
 0x526   : > { %v2706_v44 = vsel %vm458_vm1, %v2494_v3, -inf  ;;  %v4567_v45 = vpop.f32.mrb[77].mxu0 }
 0x527   : > { %2707 = vmax.xlane.f32.xlu0 %v2706_v44  ;;  %v2497_v48 = vpop.f32.mrb[78].mxu0 }
 0x528   : > { %v4568_v49 = vpop.f32.mrb[79].mxu0 }
 0x52d   : > { %v2574_v17 = vpop.f32.mrb[80].mxu0 }
 0x52e   : > { %v2712_v47 = vsel %vm458_vm1, %v2574_v17, -inf  ;;  %v4579_v43 = vpop.f32.mrb[81].mxu0 }
 0x52f   : > { %2713 = vmax.xlane.f32.xlu0 %v2712_v47  ;;  %v2577_v51 = vpop.f32.mrb[82].mxu0 }
 0x530   : > { %v4580_v11 = vpop.f32.mrb[83].mxu0 }
 0x533   : > { %v5514_v59 = vpop.f32.mrb[72].mxu1 }
 0x534   : > { %v2376_v52 = vpack.c.bf16 %v5514_v59, %v5478_v20  ;;  %v4513_v9 = vpop.f32.mrb[73].mxu1  ;;  %v4784_v20 = vld [vmem:[%s5814_s3 + $0x11c] sm:$0xff]   ;;  %v4788_v59 = vld [vmem:[%s5814_s3 + $0x12c] sm:$0xff]  }
 0x535   : > { %v2115_v16 = vpop.f32.mrb[74].mxu1  ;;  %v2654_v25 = vpop.f32.mrb[84].mxu0 }
 0x536   : > { %v4514_v40 = vpop.f32.mrb[75].mxu1  ;;  %v2718_v53 = vsel %vm458_vm1, %v2654_v25, -inf  ;;  %v4591_v54 = vpop.f32.mrb[85].mxu0 }
 0x537   : > { %2719 = vmax.xlane.f32.xlu0 %v2718_v53  ;;  %v2657_v55 = vpop.f32.mrb[86].mxu0 }
 0x538   : > { %v4592_v57 = vpop.f32.mrb[87].mxu0 }
 0x53b   : > { %v5519_v15 = vpop.f32.mrb[76].mxu1 }
 0x53c   : > { %v2377_v2 = vpack.c.bf16 %v5519_v15, %v5480_v7  ;;  %v4525_v62 = vpop.f32.mrb[77].mxu1  ;;  %v4785_v7 = vld [vmem:[%s5814_s3 + $0x164] sm:$0xff]   ;;  %v4790_v15 = vld [vmem:[%s5814_s3 + $0x134] sm:$0xff]  }
 0x53d   : > { %v2201_v63 = vpop.f32.mrb[78].mxu1 }
 0x53e   : > { %v4526_v1 = vpop.f32.mrb[79].mxu1 }
 0x543   : > { %v5523_v13 = vpop.f32.mrb[80].mxu1 }
 0x544   : > { %v2378_v60 = vpack.c.bf16 %v5523_v13, %v5492_v31  ;;  %v4537_v4 = vpop.f32.mrb[81].mxu1  ;;  %v4786_v31 = vld [vmem:[%s5814_s3 + $0x124] sm:$0xff]   ;;  %v4792_v13 = vld [vmem:[%s5814_s3 + $0x13c] sm:$0xff]  }
 0x545   : > { %v2287_v8 = vpop.f32.mrb[82].mxu1 }
 0x546   : > { %v4538_v46 = vpop.f32.mrb[83].mxu1 }
 0x5ac   : > { %v2702_v18 = vpop.xlane.xlu0 %2701 }
 0x5ad   : > { %v2724_v58 = vsub.f32 %v2414_v38, %v2702_v18 }
 0x5af   : > { %v2732_v19 = vmul.f32 1.442695, %v2724_v58 }
 0x5b1   : > { %4861 = vpow2.f32 %v2732_v19 }
 0x5b4   : > { %v2708_v12 = vpop.xlane.xlu0 %2707 }
 0x5b5   : > { %v2726_v21 = vsub.f32 %v2494_v3, %v2708_v12 }
 0x5b7   : > { %v2736_v10 = vmul.f32 1.442695, %v2726_v21 }
 0x5b9   : > { %4863 = vpow2.f32 %v2736_v10 }
 0x5bb   : > { %v4862_v14 = vpop.eup %4861 }
 0x5bc   : > { %v2714_v22 = vpop.xlane.xlu0 %2713  ;;  %v2748_v24 = vsel %vm458_vm1, %v4862_v14, 0.0 }
 0x5bd   : > { %v2728_v29 = vsub.f32 %v2574_v17, %v2714_v22  ;;  %2749 = vadd.xlane.f32.xlu0 %v2748_v24 }
 0x5bf   : > { %v2740_v30 = vmul.f32 1.442695, %v2728_v29 }
 0x5c1   : > { %4865 = vpow2.f32 %v2740_v30 }
 0x5c3   : > { %v4864_v6 = vpop.eup %4863 }
 0x5c4   : > { %v2720_v34 = vpop.xlane.xlu0 %2719  ;;  %v2754_v32 = vsel %vm458_vm1, %v4864_v6, 0.0 }
 0x5c5   : > { %v2730_v35 = vsub.f32 %v2654_v25, %v2720_v34  ;;  %2755 = vadd.xlane.f32.xlu0 %v2754_v32 }
 0x5c7   : > { %v2744_v36 = vmul.f32 1.442695, %v2730_v35 }
 0x5c9   : > { %4867 = vpow2.f32 %v2744_v36 }
 0x5cb   : > { %v4866_v37 = vpop.eup %4865 }
 0x5cc   : > { %v5529_v38 = vpop.f32.mrb[84].mxu1  ;;  %v2760_v41 = vsel %vm458_vm1, %v4866_v37, 0.0 }
 0x5cd   : > { %v2379_v28 = vpack.c.bf16 %v5529_v38, %v5504_v56  ;;  %v4549_v42 = vpop.f32.mrb[85].mxu1  ;;  %2761 = vadd.xlane.f32.xlu0 %v2760_v41  ;;  %v4787_v56 = vld [vmem:[%s5814_s3 + $0x16c] sm:$0xff]   ;;  %v4794_v38 = vld [vmem:[%s5814_s3 + $0x144] sm:$0xff]  }
 0x5ce   : > { %v2373_v5 = vpop.f32.mrb[86].mxu1 }
 0x5cf   : > { %v4550_v3 = vpop.f32.mrb[87].mxu1 }
 0x5d3   : > { %v4868_v44 = vpop.eup %4867 }
 0x5d4   : > { %v2454_v45 = vpop.f32.mrb[88].mxu1  ;;  %v2766_v48 = vsel %vm458_vm1, %v4868_v44, 0.0 }
 0x5d5   : > { %2767 = vadd.xlane.f32.xlu0 %v2766_v48  ;;  %v2703_v49 = vsel %vm458_vm1, %v2454_v45, -inf  ;;  %v4561_v17 = vpop.f32.mrb[89].mxu1 }
 0x5d6   : > { %2704 = vmax.xlane.f32.xlu1 %v2703_v49  ;;  %v2457_v47 = vpop.f32.mrb[90].mxu1 }
 0x5d7   : > { %v4562_v43 = vpop.f32.mrb[91].mxu1 }
 0x5dc   : > { %v2534_v51 = vpop.f32.mrb[92].mxu1 }
 0x5dd   : > { %v2709_v11 = vsel %vm458_vm1, %v2534_v51, -inf  ;;  %v4573_v9 = vpop.f32.mrb[93].mxu1 }
 0x5de   : > { %2710 = vmax.xlane.f32.xlu1 %v2709_v11  ;;  %v2537_v16 = vpop.f32.mrb[94].mxu1 }
 0x5df   : > { %v4574_v25 = vpop.f32.mrb[95].mxu1 }
 0x5e0   : > { %v4765_v25 = vld [vmem:[%s5814_s3 + $0xd0] sm:$0xff]  }
 0x5e4   : > { %v2614_v40 = vpop.f32.mrb[96].mxu1 }
 0x5e5   : > { %v2715_v53 = vsel %vm458_vm1, %v2614_v40, -inf  ;;  %v4585_v54 = vpop.f32.mrb[97].mxu1 }
 0x5e6   : > { %2716 = vmax.xlane.f32.xlu1 %v2715_v53  ;;  %v2617_v55 = vpop.f32.mrb[98].mxu1  ;;  %v4767_v53 = vld [vmem:[%s5814_s3 + $0xe0] sm:$0xff]   ;;  %v4768_v54 = vld [vmem:[%s5814_s3 + $0xe8] sm:$0xff]  }
 0x5e7   : > { %v4586_v57 = vpop.f32.mrb[99].mxu1  ;;  %v4769_v55 = vld [vmem:[%s5814_s3 + $0xf0] sm:$0xff]  }
 0x5e8   : > { %v4770_v57 = vld [vmem:[%s5814_s3 + $0xf8] sm:$0xff]  }
 0x5ec   : > { %v2694_v62 = vpop.f32.mrb[100].mxu1 }
 0x5ed   : > { %v2721_v63 = vsel %vm458_vm1, %v2694_v62, -inf  ;;  %v4597_v1 = vpop.f32.mrb[101].mxu1 }
 0x5ee   : > { %2722 = vmax.xlane.f32.xlu1 %v2721_v63  ;;  %v2697_v4 = vpop.f32.mrb[102].mxu1 }
 0x5ef   : > { %v4598_v8 = vpop.f32.mrb[103].mxu1 }
 0x64a   : > { %v2750_v46 = vpop.xlane.xlu0 %2749 }
 0x64b   : > { %4869 = vrcp.f32 %v2750_v46 }
 0x652   : > { %v2756_v18 = vpop.xlane.xlu0 %2755 }
 0x653   : > { %4871 = vrcp.f32 %v2756_v18 }
 0x655   : > { %v4870_v58 = vpop.eup %4869 }
 0x656   : > { %v2780_v19 = vmul.f32 %v4870_v58, %v4862_v14 }
 0x658   : > { %v2788_v12 = vpack.c.bf16 %v2780_v19, %v2780_v19 }
 0x65a   : > { %4602 = vmatmul.mubr.msk.bf16.vlgmr.msra.gmra.mrb[88].mxu0 %vm458_vm1, %v2788_v12  ;;  %v2762_v21 = vpop.xlane.xlu0 %2761 }
 0x65b   : > { %4612 = vmatpush3.bf16.msra.mxu0 %v5374_v26  ;;  %4873 = vrcp.f32 %v2762_v21  ;;  %4613 = vmatprep.mubr.msk.bf16.mxu0 %vm4906_vm0, %v4905_v0 }
 0x65c   : > { %4623 = vmatprep.subr.bf16.mxu0 %v4905_v0 }
 0x65d   : > { %v4872_v10 = vpop.eup %4871 }
 0x65e   : > { %v2782_v22 = vmul.f32 %v4872_v10, %v4864_v6 }
 0x660   : > { %v2790_v24 = vpack.c.bf16 %v2782_v22, %v2782_v22 }
 0x662   : > { %4614 = vmatmul.mubr.msk.bf16.vlgmr.msra.gmra.mrb[92].mxu0 %vm458_vm1, %v2790_v24  ;;  %v2768_v29 = vpop.xlane.xlu0 %2767 }
 0x663   : > { %4624 = vmatpush3.bf16.msra.mxu0 %v5386_v61  ;;  %4875 = vrcp.f32 %v2768_v29  ;;  %v2705_v14 = vpop.xlane.xlu1 %2704  ;;  %4625 = vmatprep.mubr.msk.bf16.mxu0 %vm4906_vm0, %v4905_v0 }
 0x664   : > { %v2725_v26 = vsub.f32 %v2454_v45, %v2705_v14  ;;  %4635 = vmatprep.subr.bf16.mxu0 %v4905_v0 }
 0x665   : > { %v4874_v30 = vpop.eup %4873 }
 0x666   : > { %v2784_v34 = vmul.f32 %v4874_v30, %v4866_v37  ;;  %v2734_v32 = vmul.f32 1.442695, %v2725_v26 }
 0x668   : > { %4877 = vpow2.f32 %v2734_v32  ;;  %v2792_v35 = vpack.c.bf16 %v2784_v34, %v2784_v34 }
 0x66a   : > { %4626 = vmatmul.mubr.msk.bf16.vlgmr.msra.gmra.mrb[96].mxu0 %vm458_vm1, %v2792_v35 }
 0x66b   : > { %4636 = vmatpush3.bf16.msra.mxu0 %v5395_v33  ;;  %v2711_v6 = vpop.xlane.xlu1 %2710  ;;  %4637 = vmatprep.mubr.msk.bf16.mxu0 %vm4906_vm0, %v4905_v0 }
 0x66c   : > { %v2727_v61 = vsub.f32 %v2534_v51, %v2711_v6  ;;  %4647 = vmatprep.subr.bf16.mxu0 %v4765_v25 }
 0x66d   : > { %v4876_v36 = vpop.eup %4875 }
 0x66e   : > { %v2786_v41 = vmul.f32 %v4876_v36, %v4868_v44  ;;  %v2738_v42 = vmul.f32 1.442695, %v2727_v61 }
 0x670   : > { %v2794_v5 = vpack.c.bf16 %v2786_v41, %v2786_v41  ;;  %4879 = vpow2.f32 %v2738_v42 }
 0x672   : > { %v4878_v3 = vpop.eup %4877  ;;  %4638 = vmatmul.mubr.msk.bf16.vlgmr.msra.gmra.mrb[100].mxu0 %vm458_vm1, %v2794_v5 }
 0x673   : > { %v2717_v37 = vpop.xlane.xlu1 %2716  ;;  %v2751_v45 = vsel %vm458_vm1, %v4878_v3, 0.0  ;;  %4648 = vmatpush3.bf16.msra.mxu0 %v4765_v25 }
 0x674   : > { %v2729_v48 = vsub.f32 %v2614_v40, %v2717_v37  ;;  %2752 = vadd.xlane.f32.xlu1 %v2751_v45  ;;  %v4766_v40 = vld [vmem:[%s5814_s3 + $0xd8] sm:$0xff]   ;;  %v4771_v45 = vld [vmem:[%s5814_s3 + $0x100] sm:$0xff]  }
 0x675   : > { %4649 = vmatprep.subr.bf16.mxu0 %v4766_v40 }
 0x676   : > { %v2742_v49 = vmul.f32 1.442695, %v2729_v48  ;;  %v4772_v48 = vld [vmem:[%s5814_s3 + $0x108] sm:$0xff]  }
 0x677   : > { %4650 = vmatpush3.bf16.msra.mxu0 %v4766_v40 }
 0x678   : > { %4881 = vpow2.f32 %v2742_v49  ;;  %4651 = vmatprep.subr.bf16.mxu0 %v4767_v53  ;;  %v4773_v49 = vld [vmem:[%s5814_s3 + $0x90] sm:$0xff]  }
 0x67a   : > { %v4880_v33 = vpop.eup %4879 }
 0x67b   : > { %v2723_v17 = vpop.xlane.xlu1 %2722  ;;  %v2757_v47 = vsel %vm458_vm1, %v4880_v33, 0.0  ;;  %4652 = vmatpush3.bf16.msra.mxu0 %v4767_v53  ;;  %v4774_v53 = vld [vmem:[%s5814_s3 + $0x98] sm:$0xff]  }
 0x67c   : > { %v2731_v43 = vsub.f32 %v2694_v62, %v2723_v17  ;;  %2758 = vadd.xlane.f32.xlu1 %v2757_v47  ;;  %4653 = vmatprep.subr.bf16.mxu0 %v4768_v54  ;;  %v4782_v17 = vld [vmem:[%s5814_s3 + $0x114] sm:$0xff]   ;;  %v4783_v47 = vld [vmem:[%s5814_s3 + $0x15c] sm:$0xff]  }
 0x67e   : > { %v2746_v44 = vmul.f32 1.442695, %v2731_v43 }
 0x67f   : > { %4654 = vmatpush3.bf16.msra.mxu0 %v4768_v54 }
 0x680   : > { %4883 = vpow2.f32 %v2746_v44  ;;  %4655 = vmatprep.subr.bf16.mxu0 %v4769_v55 }
 0x682   : > { %v4882_v51 = vpop.eup %4881 }
 0x683   : > { %v2763_v11 = vsel %vm458_vm1, %v4882_v51, 0.0  ;;  %4656 = vmatpush3.bf16.msra.mxu0 %v4769_v55 }
 0x684   : > { %2764 = vadd.xlane.f32.xlu1 %v2763_v11  ;;  %4657 = vmatprep.subr.bf16.mxu0 %v4770_v57 }
 0x687   : > { %4658 = vmatpush3.bf16.msra.mxu0 %v4770_v57  ;;  %v4775_v57 = vld [vmem:[%s5814_s3 + $0xa0] sm:$0xff]  }
 0x688   : > { %4659 = vmatprep.subr.bf16.mxu0 %v4771_v45 }
 0x68a   : > { %v4884_v9 = vpop.eup %4883 }
 0x68b   : > { %v2769_v16 = vsel %vm458_vm1, %v4884_v9, 0.0  ;;  %4660 = vmatpush3.bf16.msra.mxu0 %v4771_v45 }
 0x68c   : > { %2770 = vadd.xlane.f32.xlu1 %v2769_v16  ;;  %4661 = vmatprep.subr.bf16.mxu0 %v4772_v48 }
 0x68f   : > { %4662 = vmatpush3.bf16.msra.mxu0 %v4772_v48 }
 0x690   : > { %4671 = vmatprep.subr.bf16.mxu0 %v4773_v49 }
 0x701   : > { %v2753_v62 = vpop.xlane.xlu1 %2752 }
 0x702   : > { %4885 = vrcp.f32 %v2753_v62 }
 0x709   : > { %v2759_v63 = vpop.xlane.xlu1 %2758 }
 0x70a   : > { %4887 = vrcp.f32 %v2759_v63 }
 0x70c   : > { %v4886_v1 = vpop.eup %4885 }
 0x70d   : > { %v2781_v4 = vmul.f32 %v4886_v1, %v4878_v3 }
 0x70f   : > { %v2789_v8 = vpack.c.bf16 %v2781_v4, %v2781_v4  ;;  %v4776_v4 = vld [vmem:[%s5814_s3 + $0xa8] sm:$0xff]  }
 0x711   : > { %4608 = vmatmul.mubr.msk.bf16.vlgmr.msra.gmra.mrb[104].mxu1 %vm458_vm1, %v2789_v8  ;;  %v2765_v46 = vpop.xlane.xlu1 %2764 }
 0x712   : > { %4618 = vmatpush3.bf16.msra.mxu1 %v5370_v39  ;;  %4889 = vrcp.f32 %v2765_v46  ;;  %4619 = vmatprep.mubr.msk.bf16.mxu1 %vm4906_vm0, %v4905_v0 }
 0x713   : > { %4629 = vmatprep.subr.bf16.mxu1 %v4905_v0 }
 0x714   : > { %v4888_v18 = vpop.eup %4887 }
 0x715   : > { %v2783_v58 = vmul.f32 %v4888_v18, %v4880_v33  ;;  %v4781_v33 = vld [vmem:[%s5814_s3 + $0x154] sm:$0xff]  }
 0x716   : > { %v4777_v18 = vld [vmem:[%s5814_s3 + $0xb0] sm:$0xff]  }
 0x717   : > { %v2791_v19 = vpack.c.bf16 %v2783_v58, %v2783_v58 }
 0x719   : > { %4620 = vmatmul.mubr.msk.bf16.vlgmr.msra.gmra.mrb[108].mxu1 %vm458_vm1, %v2791_v19  ;;  %v2771_v12 = vpop.xlane.xlu1 %2770 }
 0x71a   : > { %4630 = vmatpush3.bf16.msra.mxu1 %v5384_v50  ;;  %4891 = vrcp.f32 %v2771_v12  ;;  %4631 = vmatprep.mubr.msk.bf16.mxu1 %vm4906_vm0, %v4905_v0 }
 0x71b   : > { %4641 = vmatprep.subr.bf16.mxu1 %v4905_v0 }
 0x71c   : > { %v4890_v39 = vpop.eup %4889 }
 0x71d   : > { %v2785_v21 = vmul.f32 %v4890_v39, %v4882_v51  ;;  %v4778_v39 = vld [vmem:[%s5814_s3 + $0xb8] sm:$0xff]  }
 0x71f   : > { %v2793_v10 = vpack.c.bf16 %v2785_v21, %v2785_v21 }
 0x721   : > { %4632 = vmatmul.mubr.msk.bf16.vlgmr.msra.gmra.mrb[112].mxu1 %vm458_vm1, %v2793_v10 }
 0x722   : > { %4642 = vmatpush3.bf16.msra.mxu1 %v5393_v23  ;;  %4643 = vmatprep.mubr.msk.bf16.mxu1 %vm4906_vm0, %v4905_v0 }
 0x723   : > { %4242 = vmatprep.subr.bf16.mxu1 %v4781_v33 }
 0x724   : > { %v4892_v22 = vpop.eup %4891 }
 0x725   : > { %v2787_v24 = vmul.f32 %v4892_v22, %v4884_v9  ;;  %v4779_v22 = vld [vmem:[%s5814_s3 + $0xc0] sm:$0xff]  }
 0x727   : > { %v2795_v29 = vpack.c.bf16 %v2787_v24, %v2787_v24  ;;  %v4780_v24 = vld [vmem:[%s5814_s3 + $0xc8] sm:$0xff]  }
 0x729   : > { %4644 = vmatmul.mubr.msk.bf16.vlgmr.msra.gmra.mrb[116].mxu1 %vm458_vm1, %v2795_v29  ;;  %v4796_v29 = vld [vmem:[%s5814_s3 + $0x14c] sm:$0xff]  }
 0x72a   : > { %4243 = vmatpush3.bf16.msra.mxu1 %v4782_v17 }
 0x72b   : > { %4244 = vmatprep.subr.bf16.mxu1 %v4783_v47 }
 0x72d   : > { %v2833_v50 = vpop.f32.mrb[88].mxu0 }
 0x72e   : > { %v4603_v14 = vpop.f32.mrb[89].mxu0  ;;  %4245 = vmatpush3.bf16.msra.mxu1 %v4784_v20 }
 0x72f   : > { %v2836_v26 = vpop.f32.mrb[90].mxu0  ;;  %4246 = vmatprep.subr.bf16.mxu1 %v4785_v7  ;;  %v328_v14 = vld [vmem:[%s5814_s3 + $0x110] sm:$0x1] }
 0x730   : > { %v4604_v30 = vpop.f32.mrb[91].mxu0  ;;  %v3370_v26 = vunpack.c.l.bf16 %v328_v14 }
 0x732   : > { %4247 = vmatpush3.bf16.msra.mxu1 %v4786_v31  ;;  %v3374_v30 = vrot.slane %v3370_v26, %v5080_v27 }
 0x733   : > { %4248 = vmatprep.subr.bf16.mxu1 %v4787_v56 }
 0x735   : > { %v2919_v34 = vpop.f32.mrb[92].mxu0 }
 0x736   : > { %v4615_v32 = vpop.f32.mrb[93].mxu0  ;;  %4249 = vmatpush3.bf16.msra.mxu1 %v4788_v59 }
 0x737   : > { %v2922_v35 = vpop.f32.mrb[94].mxu0 }
 0x738   : > { %v4616_v6 = vpop.f32.mrb[95].mxu0 }
 0x73d   : > { %v3005_v61 = vpop.f32.mrb[96].mxu0 }
 0x73e   : > { %v4627_v36 = vpop.f32.mrb[97].mxu0 }
 0x73f   : > { %v3008_v41 = vpop.f32.mrb[98].mxu0 }
 0x740   : > { %v4628_v23 = vpop.f32.mrb[99].mxu0 }
 0x745   : > { %v3091_v42 = vpop.f32.mrb[100].mxu0 }
 0x746   : > { %v4639_v5 = vpop.f32.mrb[101].mxu0 }
 0x747   : > { %v3094_v3 = vpop.f32.mrb[102].mxu0 }
 0x748   : > { %v4640_v37 = vpop.f32.mrb[103].mxu0 }
 0x7e4   : > { %v2876_v43 = vpop.f32.mrb[104].mxu1 }
 0x7e5   : > { %v3140_v44 = vpack.c.bf16 %v2876_v43, %v2833_v50  ;;  %v4609_v51 = vpop.f32.mrb[105].mxu1  ;;  %v4797_v50 = vld [vmem:[%s5814_s3 + $0x1d4] sm:$0xff]  }
 0x7e6   : > { %v2879_v11 = vpop.f32.mrb[106].mxu1 }
 0x7e7   : > { %v4610_v9 = vpop.f32.mrb[107].mxu1  ;;  %4663 = vmatprep.mubr.bf16.mxu0 %v3140_v44 }
 0x7ec   : > { %v2962_v16 = vpop.f32.mrb[108].mxu1 }
 0x7ed   : > { %v3141_v25 = vpack.c.bf16 %v2962_v16, %v2919_v34  ;;  %v4621_v40 = vpop.f32.mrb[109].mxu1 }
 0x7ee   : > { %v2965_v54 = vpop.f32.mrb[110].mxu1 }
 0x7ef   : > { %v4622_v55 = vpop.f32.mrb[111].mxu1  ;;  %4664 = vmatmul.mubr.bf16.vlgmr.msra.gmra.mrb[104].mxu0 %v3141_v25 }
 0x7f0   : > { %4672 = vmatpush3.bf16.msra.mxu0 %v4773_v49 }
 0x7f1   : > { %4673 = vmatprep.subr.bf16.mxu0 %v4774_v53 }
 0x7f4   : > { %4674 = vmatpush3.bf16.msra.mxu0 %v4774_v53  ;;  %v3048_v62 = vpop.f32.mrb[112].mxu1 }
 0x7f5   : > { %v3142_v63 = vpack.c.bf16 %v3048_v62, %v3005_v61  ;;  %v4633_v1 = vpop.f32.mrb[113].mxu1  ;;  %4675 = vmatprep.subr.bf16.mxu0 %v4775_v57 }
 0x7f6   : > { %v3051_v8 = vpop.f32.mrb[114].mxu1 }
 0x7f7   : > { %v4634_v46 = vpop.f32.mrb[115].mxu1  ;;  %4667 = vmatprep.mubr.bf16.mxu0 %v3142_v63 }
 0x7f8   : > { %4676 = vmatpush3.bf16.msra.mxu0 %v4775_v57 }
 0x7f9   : > { %4677 = vmatprep.subr.bf16.mxu0 %v4776_v4 }
 0x7fc   : > { %4678 = vmatpush3.bf16.msra.mxu0 %v4776_v4  ;;  %v3134_v58 = vpop.f32.mrb[116].mxu1 }
 0x7fd   : > { %v3143_v19 = vpack.c.bf16 %v3134_v58, %v3091_v42  ;;  %v4645_v12 = vpop.f32.mrb[117].mxu1  ;;  %4679 = vmatprep.subr.bf16.mxu0 %v4777_v18 }
 0x7fe   : > { %v3137_v21 = vpop.f32.mrb[118].mxu1 }
 0x7ff   : > { %v4646_v10 = vpop.f32.mrb[119].mxu1  ;;  %4668 = vmatmul.mubr.bf16.gmra.mrb[108].mxu0 %v3143_v19 }
 0x800   : > { %4680 = vmatpush3.bf16.msra.mxu0 %v4777_v18  ;;  %4687 = vmatprep.mubr.bf16.mxu0 %v2376_v52  ;;  %v4789_v52 = vld [vmem:[%s5814_s3 + $0x174] sm:$0xff]  }
 0x801   : > { %4681 = vmatprep.subr.bf16.mxu0 %v4778_v39  ;;  %4250 = vmatprep.subr.bf16.mxu1 %v4789_v52 }
 0x802   : > { %4251 = vmatpush3.bf16.msra.mxu1 %v4790_v15 }
 0x804   : > { %4682 = vmatpush3.bf16.msra.mxu0 %v4778_v39 }
 0x805   : > { %4683 = vmatprep.subr.bf16.mxu0 %v4779_v22 }
 0x808   : > { %4684 = vmatpush3.bf16.msra.mxu0 %v4779_v22 }
 0x809   : > { %4685 = vmatprep.subr.bf16.mxu0 %v4780_v24 }
 0x80c   : > { %4686 = vmatpush3.bf16.msra.mxu0 %v4780_v24 }
 0x80d   : > { %4695 = vmatprep.subr.bf16.mxu0 %v4905_v0 }
 0x80f   : > { %4688 = vmatmul.mubr.bf16.vlgmr.msra.gmra.mrb[104].mxu0 %v2377_v2  ;;  %v4791_v2 = vld [vmem:[%s5814_s3 + $0x17c] sm:$0xff]  }
 0x810   : > { %4691 = vmatprep.mubr.bf16.mxu0 %v2378_v60  ;;  %4252 = vmatprep.subr.bf16.mxu1 %v4791_v2  ;;  %v4793_v60 = vld [vmem:[%s5814_s3 + $0x184] sm:$0xff]  }
 0x811   : > { %4253 = vmatpush3.bf16.msra.mxu1 %v4792_v13 }
 0x812   : > { %4254 = vmatprep.subr.bf16.mxu1 %v4793_v60 }
 0x815   : > { %4255 = vmatpush3.bf16.msra.mxu1 %v4794_v38 }
 0x817   : > { %4692 = vmatmul.mubr.bf16.gmra.mrb[108].mxu0 %v2379_v28  ;;  %v4795_v28 = vld [vmem:[%s5814_s3 + $0x18c] sm:$0xff]  }
 0x818   : > { %4711 = vmatprep.mubr.msk.bf16.mxu0 %vm4906_vm0, %v4905_v0  ;;  %4256 = vmatprep.subr.bf16.mxu1 %v4795_v28 }
 0x819   : > { %4257 = vmatpush3.bf16.msra.mxu1 %v4796_v29 }
 0x81a   : > { %4264 = vmatprep.subr.bf16.mxu1 %v4797_v50 }
 0x8e2   : > { %v4689_v34 = vpop.f32.mrb[104].mxu0 }
 0x8e3   : > { %v3377_v32 = vadd.f32 %v4689_v34, %v3374_v30  ;;  %v3339_v35 = vpop.f32.mrb[105].mxu0 }
 0x8e4   : > { %v3375_v6 = vadd.f32 %v3374_v30, %v3339_v35  ;;  %v4690_v61 = vpop.f32.mrb[106].mxu0 }
 0x8e5   : > { %v3385_v36 = vmax.f32 %v3377_v32, 0.0  ;;  %v3378_v41 = vadd.f32 %v4690_v61, %v3374_v30  ;;  %v3342_v23 = vpop.f32.mrb[107].mxu0 }
 0x8e6   : > { %v3383_v42 = vmax.f32 %v3375_v6, 0.0  ;;  %v3376_v5 = vadd.f32 %v3374_v30, %v3342_v23 }
 0x8e7   : > { %v4084_v3 = vpack.c.bf16 %v3385_v36, %v3385_v36  ;;  %v3386_v37 = vmax.f32 %v3378_v41, 0.0 }
 0x8e8   : > { %v4082_v45 = vpack.c.bf16 %v3383_v42, %v3383_v42  ;;  %v3384_v48 = vmax.f32 %v3376_v5, 0.0 }
 0x8e9   : > { %v3417_v49 = vunpack.c.l.b16 %v4084_v3  ;;  %v4085_v33 = vpack.c.bf16 %v3386_v37, %v3386_v37 }
 0x8ea   : > { %v3415_v17 = vunpack.c.l.b16 %v4082_v45  ;;  %v4083_v47 = vpack.c.bf16 %v3384_v48, %v3384_v48  ;;  %v4693_v43 = vpop.f32.mrb[108].mxu0 }
 0x8eb   : > { %v3426_v44 = vrot.slane %v3417_v49, 6  ;;  %v3448_v51 = vrot.slane %v3417_v49, 7  ;;  %v3481_v11 = vrot.slane %v3417_v49, 1  ;;  %v3418_v9 = vunpack.c.l.b16 %v4085_v33  ;;  %v3355_v16 = vpop.f32.mrb[109].mxu0 }
 0x8ec   : > { %v3446_v25 = vrot.slane %v3415_v17, 1  ;;  %v3462_v40 = vrot.slane %v3415_v17, 2  ;;  %v3478_v53 = vrot.slane %v3415_v17, 3  ;;  %v3416_v54 = vunpack.c.l.b16 %v4083_v47  ;;  %v4694_v55 = vpop.f32.mrb[110].mxu0 }
 0x8ed   : > { %v3429_v57 = vrot.slane %v3418_v9, 5  ;;  %v3450_v62 = vrot.slane %v3418_v9, 6  ;;  %v3466_v63 = vrot.slane %v3418_v9, 7  ;;  %v3381_v1 = vadd.f32 %v4693_v43, %v3374_v30  ;;  %v3358_v4 = vpop.f32.mrb[111].mxu0 }
 0x8ee   : > { %v3423_v8 = vrot.slane %v3416_v54, 7  ;;  %v3447_v46 = vsel %vm3424_vm2, %v3416_v54, %v3446_v25  ;;  %v3463_v18 = vrot.slane %v3416_v54, 1  ;;  %v3479_v58 = vrot.slane %v3416_v54, 2 }
 0x8ef   : > { %v3449_v19 = vsel %vm3427_vm3, %v3448_v51, %v3447_v46  ;;  %v3389_v12 = vmax.f32 %v3381_v1, 0.0  ;;  %v3379_v39 = vadd.f32 %v3374_v30, %v3355_v16  ;;  %v3382_v21 = vadd.f32 %v4694_v55, %v3374_v30  ;;  %v4798_v1 = vld [vmem:[%s5814_s3 + $0x194] sm:$0xff]  }
 0x8f0   : > { %v3425_v10 = vsel %vm3424_vm2, %v3423_v8, %v3415_v17  ;;  %v3464_v22 = vsel %vm3424_vm2, %v3463_v18, %v3462_v40  ;;  %v3480_v24 = vsel %vm3424_vm2, %v3479_v58, %v3478_v53  ;;  %v3380_v20 = vadd.f32 %v3374_v30, %v3358_v4  ;;  %v4799_v18 = vld [vmem:[%s5814_s3 + $0x1dc] sm:$0xff]  }
 0x8f1   : > { %v3428_v7 = vsel %vm3427_vm3, %v3426_v44, %v3425_v10  ;;  %v3465_v31 = vsel %vm3427_vm3, %v3417_v49, %v3464_v22  ;;  %v4088_v56 = vpack.c.bf16 %v3389_v12, %v3389_v12  ;;  %v3387_v59 = vmax.f32 %v3379_v39, 0.0  ;;  %v4800_v12 = vld [vmem:[%s5814_s3 + $0x19c] sm:$0xff]   ;;  %v4801_v39 = vld [vmem:[%s5814_s3 + $0x1e4] sm:$0xff]   ;;  %v4803_v10 = vld [vmem:[%s5814_s3 + $0x1ec] sm:$0xff]  }
 0x8f2   : > { %v3390_v52 = vmax.f32 %v3382_v21, 0.0  ;;  %v3388_v15 = vmax.f32 %v3380_v20, 0.0  ;;  %v3451_v2 = vsel %vm3430_vm4, %v3450_v62, %v3449_v19  ;;  %v3431_v13 = vsel %vm3430_vm4, %v3429_v57, %v3428_v7  ;;  %v4802_v21 = vld [vmem:[%s5814_s3 + $0x1a4] sm:$0xff]   ;;  %v4804_v22 = vld [vmem:[%s5814_s3 + $0x1ac] sm:$0xff]   ;;  %v4806_v20 = vld [vmem:[%s5814_s3 + $0x1b4] sm:$0xff]  }
 0x8f3   : > { %v3421_v60 = vunpack.c.l.b16 %v4088_v56  ;;  %v4086_v38 = vpack.c.bf16 %v3387_v59, %v3387_v59  ;;  %v3482_v28 = vsel %vm3427_vm3, %v3481_v11, %v3480_v24  ;;  %v3467_v29 = vsel %vm3430_vm4, %v3466_v63, %v3465_v31  ;;  %v4805_v24 = vld [vmem:[%s5814_s3 + $0x1f4] sm:$0xff]   ;;  %v4807_v7 = vld [vmem:[%s5814_s3 + $0x1fc] sm:$0xff]   ;;  %v4809_v56 = vld [vmem:[%s5814_s3 + $0x204] sm:$0xff]  }
 0x8f4   : > { %v4089_v50 = vpack.c.bf16 %v3390_v52, %v3390_v52  ;;  %v4087_v14 = vpack.c.bf16 %v3388_v15, %v3388_v15  ;;  %v3483_v26 = vsel %vm3430_vm4, %v3418_v9, %v3482_v28  ;;  %v4808_v31 = vld [vmem:[%s5814_s3 + $0x1bc] sm:$0xff]   ;;  %v4810_v59 = vld [vmem:[%s5814_s3 + $0x1c4] sm:$0xff]   ;;  %v4811_v52 = vld [vmem:[%s5814_s3 + $0x20c] sm:$0xff]  }
 0x8f5   : > { %v3419_v30 = vunpack.c.l.b16 %v4086_v38  ;;  %v3438_v35 = vrot.slane %v3421_v60, 2  ;;  %v3456_v6 = vrot.slane %v3421_v60, 3  ;;  %v3472_v61 = vrot.slane %v3421_v60, 4  ;;  %v4812_v15 = vld [vmem:[%s5814_s3 + $0x1cc] sm:$0xff]  }
 0x8f6   : > { %v3422_v34 = vunpack.c.l.b16 %v4089_v50  ;;  %v3420_v32 = vunpack.c.l.b16 %v4087_v14  ;;  %v3488_v36 = vrot.slane %v3421_v60, 5  ;;  %v4814_v60 = vld [vmem:[%s5814_s3 + $0x220] sm:$0xff]   ;;  %v4815_v38 = vld [vmem:[%s5814_s3 + $0x228] sm:$0xff]   ;;  %v4816_v28 = vld [vmem:[%s5814_s3 + $0x230] sm:$0xff]  }
 0x8f7   : > { %v3432_v41 = vrot.slane %v3419_v30, 4  ;;  %v3452_v23 = vrot.slane %v3419_v30, 5  ;;  %v3468_v42 = vrot.slane %v3419_v30, 6  ;;  %v3484_v5 = vrot.slane %v3419_v30, 7  ;;  %v4818_v50 = vld [vmem:[%s5814_s3 + $0x240] sm:$0xff]   ;;  %v4819_v14 = vld [vmem:[%s5814_s3 + $0x248] sm:$0xff]  }
 0x8f8   : > { %v3441_v3 = vrot.slane %v3422_v34, 1  ;;  %v3474_v37 = vrot.slane %v3422_v34, 3  ;;  %v3435_v45 = vrot.slane %v3420_v32, 3  ;;  %v3454_v48 = vrot.slane %v3420_v32, 4 }
 0x8f9   : > { %v3470_v49 = vrot.slane %v3420_v32, 5  ;;  %v3486_v33 = vrot.slane %v3420_v32, 6  ;;  %v3453_v17 = vsel %vm3433_vm5, %v3452_v23, %v3451_v2  ;;  %v3458_v47 = vrot.slane %v3422_v34, 2 }
 0x8fa   : > { %v3455_v43 = vsel %vm3436_vm6, %v3454_v48, %v3453_v17  ;;  %v3434_v44 = vsel %vm3433_vm5, %v3432_v41, %v3431_v13  ;;  %v3485_v51 = vsel %vm3433_vm5, %v3484_v5, %v3483_v26  ;;  %v3490_v11 = vrot.slane %v3422_v34, 4  ;;  %v4813_v13 = vld [vmem:[%s5814_s3 + $0x218] sm:$0xff]   ;;  %v4820_v26 = vld [vmem:[%s5814_s3 + $0x250] sm:$0xff]  }
 0x8fb   : > { %v3457_v9 = vsel %vm3439_vm7, %v3456_v6, %v3455_v43  ;;  %v3437_v16 = vsel %vm3436_vm6, %v3435_v45, %v3434_v44  ;;  %v3487_v25 = vsel %vm3436_vm6, %v3486_v33, %v3485_v51  ;;  %v3469_v40 = vsel %vm3433_vm5, %v3468_v42, %v3467_v29  ;;  %4696 = vmatpush3.bf16.msra.mxu0 %v4813_v13  ;;  %v4817_v29 = vld [vmem:[%s5814_s3 + $0x238] sm:$0xff]  }
 0x8fc   : > { %v3459_v53 = vsel %vm3442_vm8, %v3458_v47, %v3457_v9  ;;  %v3440_v54 = vsel %vm3439_vm7, %v3438_v35, %v3437_v16  ;;  %v3489_v55 = vsel %vm3439_vm7, %v3488_v36, %v3487_v25  ;;  %v3471_v57 = vsel %vm3436_vm6, %v3470_v49, %v3469_v40  ;;  %4697 = vmatprep.subr.bf16.mxu0 %v4905_v0  ;;  %v410_v33 = vld [vmem:[%s5814_s3 + $0x258] sm:$0x1] }
 0x8fd   : > { %v3460_v62 = vpack.c.b16 %v3459_v53, %v3459_v53  ;;  %v3443_v63 = vsel %vm3442_vm8, %v3441_v3, %v3440_v54  ;;  %v3491_v4 = vsel %vm3442_vm8, %v3490_v11, %v3489_v55  ;;  %v3473_v8 = vsel %vm3439_vm7, %v3472_v61, %v3471_v57  ;;  %v393_v61 = vld [vmem:[%s5814_s3 + $0x214] sm:$0x1] }
 0x8fe   : > { %v3444_v46 = vpack.c.b16 %v3443_v63, %v3443_v63  ;;  %v3475_v58 = vsel %vm3442_vm8, %v3474_v37, %v3473_v8  ;;  %v3492_v19 = vpack.c.b16 %v3491_v4, %v3491_v4  ;;  %v3494_v36 = vunpack.c.l.bf16 %v393_v61 }
 0x8ff   : > { %3723 = vmatprep.mubr.bf16.mxu1 %v3460_v62  ;;  %v3476_v2 = vpack.c.b16 %v3475_v58, %v3475_v58  ;;  %4698 = vmatpush3.bf16.msra.mxu0 %v4814_v60  ;;  %v3773_v17 = vunpack.c.l.bf16 %v410_v33 }
 0x900   : > { %3724 = vmatmul.mubr.bf16.vlgmr.msra.gmra.mrb[120].mxu1 %v3444_v46  ;;  %4699 = vmatprep.subr.bf16.mxu0 %v4905_v0  ;;  %v3498_v41 = vrot.slane %v3494_v36, %v5080_v27 }
 0x901   : > { %4265 = vmatpush3.bf16.msra.mxu1 %v4798_v1  ;;  %3763 = vmatprep.mubr.bf16.mxu1 %v3492_v19  ;;  %v3777_v47 = vrot.slane %v3773_v17, %v5080_v27 }
 0x902   : > { %4266 = vmatprep.subr.bf16.mxu1 %v4799_v18 }
 0x903   : > { %4700 = vmatpush3.bf16.msra.mxu0 %v4815_v38 }
 0x904   : > { %4701 = vmatprep.subr.bf16.mxu0 %v4905_v0 }
 0x905   : > { %4267 = vmatpush3.bf16.msra.mxu1 %v4800_v12 }
 0x906   : > { %4268 = vmatprep.subr.bf16.mxu1 %v4801_v39 }
 0x907   : > { %4702 = vmatpush3.bf16.msra.mxu0 %v4816_v28 }
 0x908   : > { %4703 = vmatprep.subr.bf16.mxu0 %v4905_v0 }
 0x909   : > { %4269 = vmatpush3.bf16.msra.mxu1 %v4802_v21 }
 0x90a   : > { %4270 = vmatprep.subr.bf16.mxu1 %v4803_v10 }
 0x90b   : > { %4704 = vmatpush3.bf16.msra.mxu0 %v4817_v29 }
 0x90c   : > { %4705 = vmatprep.subr.bf16.mxu0 %v4905_v0 }
 0x90d   : > { %4271 = vmatpush3.bf16.msra.mxu1 %v4804_v22 }
 0x90e   : > { %4272 = vmatprep.subr.bf16.mxu1 %v4805_v24 }
 0x90f   : > { %4706 = vmatpush3.bf16.msra.mxu0 %v4818_v50 }
 0x910   : > { %4707 = vmatprep.subr.bf16.mxu0 %v4905_v0 }
 0x911   : > { %4273 = vmatpush3.bf16.msra.mxu1 %v4806_v20 }
 0x912   : > { %4274 = vmatprep.subr.bf16.mxu1 %v4807_v7 }
 0x913   : > { %4708 = vmatpush3.bf16.msra.mxu0 %v4819_v14 }
 0x914   : > { %4709 = vmatprep.subr.bf16.mxu0 %v4905_v0 }
 0x915   : > { %4275 = vmatpush3.bf16.msra.mxu1 %v4808_v31 }
 0x916   : > { %4276 = vmatprep.subr.bf16.mxu1 %v4809_v56 }
 0x917   : > { %4710 = vmatpush3.bf16.msra.mxu0 %v4820_v26 }
 0x919   : > { %4277 = vmatpush3.bf16.msra.mxu1 %v4810_v59 }
 0x91a   : > { %4278 = vmatprep.subr.bf16.mxu1 %v4811_v52 }
 0x91d   : > { %4279 = vmatpush3.bf16.msra.mxu1 %v4812_v15 }
 0x920   : > { %3764 = vmatmul.mubr.bf16.vlgmr.msra.gmra.mrb[124].mxu1 %v3476_v2 }
 0x9d3   : > { %v4258_v30 = vpop.f32.mrb[120].mxu1 }
 0x9d4   : > { %v4259_v34 = vpop.f32.mrb[121].mxu1 }
 0x9d5   : > { %v4260_v32 = vadd.f32 %v4259_v34, %v4258_v30  ;;  %v4261_v35 = vpop.f32.mrb[122].mxu1 }
 0x9d6   : > { %v4262_v6 = vpop.f32.mrb[123].mxu1 }
 0x9d7   : > { %v3726_v0 = vadd.f32 %v4260_v32, %v3498_v41 }
 0x9f3   : > { %v4280_v23 = vpop.f32.mrb[124].mxu1 }
 0x9f4   : > { %v4281_v42 = vpop.f32.mrb[125].mxu1 }
 0x9f5   : > { %v4282_v5 = vadd.f32 %v4281_v42, %v4280_v23  ;;  %v4283_v3 = vpop.f32.mrb[126].mxu1 }
 0x9f6   : > { %v4284_v37 = vpop.f32.mrb[127].mxu1 }
 0x9f7   : > { %v3766_v45 = vadd.f32 %v4282_v5, %v3726_v0 }
 0x9f9   : > { %v3771_v48 = vmax.f32 %v3766_v45, 0.0 }
 0x9fb   : > { %v3772_v49 = vpack.c.bf16 %v3771_v48, %v3771_v48 }
 0x9fd   : > { %4712 = vmatmul.mubr.bf16.vlgmr.msra.gmra.mrb[112].mxu0 %v3772_v49 }
 0xad0   : > { %v3860_v43 = vpop.f32.mrb[112].mxu0 }
 0xad1   : > { %v3861_v44 = vadd.f32 %v3860_v43, %v3777_v47  ;;  %v4713_v51 = vpop.f32.mrb[113].mxu0 }
 0xad2   : > { %v3863_v11 = vpop.f32.mrb[114].mxu0 }
 0xad3   : > { %v3866_v9 = vsub.f32 0.0, %v3861_v44  ;;  %v4714_v16 = vpop.f32.mrb[115].mxu0 }
 0xad5   : > { %v3867_v25 = vmul.f32 1.442695, %v3866_v9 }
 0xad7   : > { %4893 = vpow2.f32 %v3867_v25 }
 0xae1   : > { %v4894_v40 = vpop.eup %4893 }
 0xae2   : > { %v3869_v53 = vadd.f32 1.0, %v4894_v40 }
 0xae4   : > { %4895 = vrcp.f32 %v3869_v53 }
 0xaee   : > { %v4896_v54 = vpop.eup %4895 }
 0xaef   : > { %3872 = vst [vmem:[%s225_s20] sm:$0xff] %v4896_v54 }
 0xaf0 PF: > { %s14_s15 = sadd.s32 1, %s4903_s15  }
 0xaf1   : > { %p11_p5 = scmp.ge.s32.totalorder %s14_s15, 4  }
 0xaf3   :  { %13 = sbr.rel (!%p11_p5) target bundleno = 1 (0x1), region = 69 }

</bundles_post_ra>
